<compile_context>
chip_gen: v7x
topology: tpu7x:2x2x1
jax: 0.10.0
libtpu: 0.0.40
codegen_flags: <defaults>
</compile_context>

<pallas_src>
import jax
import jax.numpy as jnp
from jax.experimental import pallas as pl
from jax.experimental.pallas import tpu as pltpu


def _rope_kernel(pos_ref, inv_freq_ref, cos_ref, sin_ref):
    # pos_ref:         (TS, 1)    f32
    # inv_freq_ref:    (1, dim)   f32   [inv_freq | inv_freq], resident
    # cos_ref/sin_ref: (TS, dim)  out_dtype
    #
    # Outer product via VPU broadcast multiply (no MXU), angles in f32.
    freqs = pos_ref[...] * inv_freq_ref[...]            # (TS, dim)
    # Single full-width, lane-dense, unmasked store per output.
    cos_ref[...] = jnp.cos(freqs).astype(cos_ref.dtype)
    sin_ref[...] = jnp.sin(freqs).astype(sin_ref.dtype)


def _round_up(x: int, m: int) -> int:
    return ((x + m - 1) // m) * m


class RotaryEmbedding:
    def __init__(self, dim: int, theta: float = 10000.0):
        assert dim % 2 == 0, "RotaryEmbedding requires an even dim"
        self.dim = dim
        self.theta = theta
        inv_freq = 1.0 / (
            theta ** (jnp.arange(0, dim, 2, dtype=jnp.float32) / dim)
        )  # (dim//2,)
        self.inv_freq = inv_freq
        # Pre-duplicated so the kernel's compute and stores are full-width
        # lane-dense (emb = concat([freqs, freqs], -1)).
        self.inv_freq_full = jnp.concatenate([inv_freq, inv_freq]).reshape(1, dim)

    def __call__(self, positions: jax.Array, out_dtype=jnp.float32):
        # positions: (S,) int or float token positions.
        # NOTE: int->f32 cast is exact only for |pos| < 2^24; angles are f32.
        S = positions.shape[0]
        dim = self.dim

        # --- Row-tile size ---------------------------------------------------
        # VMEM budget for double-buffered output tiles (~16 MiB of the scoped
        # default on every generation, incl. v7x's 32 MiB default / 64 MiB phys).
        out_bytes_per_row = 2 * dim * jnp.dtype(out_dtype).itemsize
        max_ts = max(8, (16 * 1024 * 1024) // (2 * out_bytes_per_row))
        max_ts = (max_ts // 8) * 8
        if S <= 8:
            ts = S                                  # tiny: single full block
        else:
            # Aim for >= 2 grid steps (feeds both v7x TensorCores), rows a
            # multiple of 8 (sublane), capped by the VMEM budget above.
            ts = min(max_ts, _round_up(pl.cdiv(S, 2), 8))
        grid = (pl.cdiv(S, ts),)

        pos2d = positions.astype(jnp.float32).reshape(S, 1)        # (S, 1)

        cos, sin = pl.pallas_call(
            _rope_kernel,
            out_shape=(
                jax.ShapeDtypeStruct((S, dim), out_dtype),
                jax.ShapeDtypeStruct((S, dim), out_dtype),
            ),
            grid=grid,
            in_specs=[
                pl.BlockSpec((ts, 1), lambda i: (i, 0)),           # positions tile
                pl.BlockSpec((1, dim), lambda i: (0, 0)),          # resident const
            ],
            out_specs=(
                pl.BlockSpec((ts, dim), lambda i: (i, 0)),
                pl.BlockSpec((ts, dim), lambda i: (i, 0)),
            ),
            compiler_params=pltpu.CompilerParams(
                dimension_semantics=("parallel",),                 # v7x: 2 TCs
            ),
        )(pos2d, self.inv_freq_full)
        return cos, sin


def _reference(positions, dim, theta):
    inv_freq = 1.0 / (theta ** (jnp.arange(0, dim, 2, dtype=jnp.float32) / dim))
    freqs = positions.astype(jnp.float32)[:, None] * inv_freq[None, :]
    emb = jnp.concatenate([freqs, freqs], axis=-1)
    return jnp.cos(emb), jnp.sin(emb)


if __name__ == "__main__":
    key = jax.random.PRNGKey(0)
    S, DIM, THETA = 256, 128, 10000.0   # lane-dense output (dim multiple of 128)

    # Deterministic example positions (token positions 0..S-1 shuffled).
    positions = jax.random.permutation(key, jnp.arange(S, dtype=jnp.int32))

    rope = RotaryEmbedding(DIM, THETA)
    cos_ref, sin_ref = _reference(positions, DIM, THETA)

    # Default (reference-exact) f32 path.
    cos, sin = rope(positions)
    jax.block_until_ready((cos, sin))
    assert cos.shape == (S, DIM) and sin.shape == (S, DIM)
    assert cos.dtype == jnp.float32 and sin.dtype == jnp.float32
    assert jnp.allclose(cos, cos_ref, atol=1e-5, rtol=1e-5)
    assert jnp.allclose(sin, sin_ref, atol=1e-5, rtol=1e-5)

    # bf16 store path (halves HBM write traffic); angle math still f32.
    cos_bf, sin_bf = rope(positions, out_dtype=jnp.bfloat16)
    jax.block_until_ready((cos_bf, sin_bf))
    assert cos_bf.dtype == jnp.bfloat16 and sin_bf.dtype == jnp.bfloat16
    assert jnp.allclose(cos_bf.astype(jnp.float32), cos_ref, atol=1e-2, rtol=1e-2)
    assert jnp.allclose(sin_bf.astype(jnp.float32), sin_ref, atol=1e-2, rtol=1e-2)

    print("KERNEL_OK")
</pallas_src>

<mosaic_0001>
module attributes {stable_mosaic.version = 11 : i64} {
  func.func @_rope_kernel(%arg0: i32, %arg1: memref<128x1xf32, #tpu.memory_space<vmem>>, %arg2: memref<1x128xf32, #tpu.memory_space<vmem>>, %arg3: memref<128x128xf32, #tpu.memory_space<vmem>>, %arg4: memref<128x128xf32, #tpu.memory_space<vmem>>) attributes {dimension_semantics = [#tpu.dimension_semantics<parallel>], iteration_bounds = array<i64: 2>, scalar_prefetch = 0 : i64, scratch_operands = 0 : i64, tpu.core_type = #tpu.core_type<tc>, window_params = [{transform_indices = @transform_0, window_bounds = array<i64: 128, 1>}, {pipeline_mode = #tpu.pipeline_mode<synchronous>, transform_indices = @transform_1, window_bounds = array<i64: 1, 128>}, {transform_indices = @transform_2, window_bounds = array<i64: 128, 128>}, {transform_indices = @transform_3, window_bounds = array<i64: 128, 128>}]} {
    %c0 = arith.constant 0 : index
    %c0_0 = arith.constant 0 : index
    %0 = vector.load %arg1[%c0, %c0_0] : memref<128x1xf32, #tpu.memory_space<vmem>>, vector<128x1xf32>
    %c0_1 = arith.constant 0 : index
    %c0_2 = arith.constant 0 : index
    %1 = vector.load %arg2[%c0_1, %c0_2] : memref<1x128xf32, #tpu.memory_space<vmem>>, vector<1x128xf32>
    %2 = vector.broadcast %0 : vector<128x1xf32> to vector<128x128xf32>
    %3 = vector.broadcast %1 : vector<1x128xf32> to vector<128x128xf32>
    %4 = arith.mulf %2, %3 : vector<128x128xf32>
    %5 = math.cos %4 : vector<128x128xf32>
    %c0_3 = arith.constant 0 : index
    %c0_4 = arith.constant 0 : index
    %6 = vector.load %arg3[%c0_3, %c0_4] : memref<128x128xf32, #tpu.memory_space<vmem>>, vector<128x128xf32>
    tpu.vector_store %arg3[%c0_3, %c0_4], %5 {strides = array<i32>} : memref<128x128xf32, #tpu.memory_space<vmem>>, vector<128x128xf32>,
    %7 = math.sin %4 : vector<128x128xf32>
    %c0_5 = arith.constant 0 : index
    %c0_6 = arith.constant 0 : index
    %8 = vector.load %arg4[%c0_5, %c0_6] : memref<128x128xf32, #tpu.memory_space<vmem>>, vector<128x128xf32>
    tpu.vector_store %arg4[%c0_5, %c0_6], %7 {strides = array<i32>} : memref<128x128xf32, #tpu.memory_space<vmem>>, vector<128x128xf32>,
    return
  }
  func.func @transform_0(%arg0: i32) -> (i32, i32) {
    %c0_i32 = arith.constant 0 : i32
    %c0_i32_0 = arith.constant 0 : i32
    return %arg0, %c0_i32 : i32, i32
  }
  func.func @transform_1(%arg0: i32) -> (i32, i32) {
    %c0_i32 = arith.constant 0 : i32
    %c0_i32_0 = arith.constant 0 : i32
    %c0_i32_1 = arith.constant 0 : i32
    return %c0_i32, %c0_i32_0 : i32, i32
  }
  func.func @transform_2(%arg0: i32) -> (i32, i32) {
    %c0_i32 = arith.constant 0 : i32
    %c0_i32_0 = arith.constant 0 : i32
    return %arg0, %c0_i32 : i32, i32
  }
  func.func @transform_3(%arg0: i32) -> (i32, i32) {
    %c0_i32 = arith.constant 0 : i32
    %c0_i32_0 = arith.constant 0 : i32
    return %arg0, %c0_i32 : i32, i32
  }
}

</mosaic_0001>

<bundles_post_ra>
// kernel: tpu_custom_call.1
= control target key start
LH: loop header
LB: loop body
LE: loop exit
PB: predicated region body
PF: predicated region fallthrough
CT: control target
= control target key end

     0   :  { %9 = vsyncpa [#allocation3], 0  ;;  %s5966_s0 = inlined_call_operand.vmem [shape: f32[256,1], index: 0, kind: input, shape index: {}]   ;;  %s5967_s1 = inlined_call_operand.vmem [shape: f32[1,128], index: 1, kind: input, shape index: {}]   ;;  %s5968_s2 = inlined_call_operand.hbm [shape: f32[256,128], index: 2, kind: output, shape index: {0}]   ;;  %s5969_s3 = inlined_call_operand.hbm [shape: f32[256,128], index: 3, kind: output, shape index: {1}]  }
   0x1   :  { %11 = vsyncpa [#allocation3 + $0x1], 0 }
   0x2   :  { %12 = vsyncpa [#allocation5], 0 }
   0x3   :  { %14 = vsyncpa [#allocation5 + $0x1], 0  ;;  %s4235_s12 = smov 0   ;;  %s4237_s13 = smov 0  }
   0x4   :  { %s4239_s14 = smov 0   ;;  %s4241_s15 = smov 0  }
   0x5 LB: > { %s4256_s16 = sadd.s32 4294967295, %s4202_s15   ;;  %s3776_s17 = sadd.s32 4294967294, %s4202_s15   ;;  %s4202_s15 = sphi %s4241_s15, %s6003_s15   ;;  %s4198_s14 = sphi %s4239_s14, %s6002_s14   ;;  %s4194_s13 = sphi %s4237_s13, %s6001_s13   ;;  %s4190_s12 = sphi %s4235_s12, %s6000_s12  }
   0x6   : > { %s4260_s18 = sadd.s32 1, %s4202_s15   ;;  %s74_s19 = sadd.s32 1, %s4198_s14 }
   0x7   : > { %s71_s20 = ssub.s32 %s4202_s15, %s4260_s18  ;;  %p84_p0 = scmp.ne.s32.totalorder %s4198_s14, %s4194_s13 }
   0x8   : > { %p72_p1 = scmp.eq.s32.totalorder %s71_s20, 0  ;;  %p85_p2 = scmp.eq.s32.totalorder %s4256_s16, 1 }
   0x9   : > { %p90_p3 = scmp.ne.s32.totalorder %s4194_s13, %s4190_s12  ;;  %p91_p4 = scmp.eq.s32.totalorder %s3776_s17, 1 }
   0xa   : > { %s4271_s21 = scalar_select %p72_p1, %s4198_s14, %s74_s19  }
   0xb   : > { %p4273_p5 = por %p85_p2, %p84_p0  ;;  %p4277_p6 = por %p91_p4, %p90_p3 }
   0xc   : > { %p3779_p7 = scmp.ge.s32.totalorder %s4202_s15, 1  ;;  %p147_p8 = scmp.lt.s32.totalorder %s4202_s15, 3 }
   0xe   : > { %p148_p9 = pnand %p3779_p7, %p147_p8 }
   0xf   : > { %s3782_s24 = sshll.u32 (!%p148_p9), %s4256_s16, 4  ;;  %v4204_v0 = vmov (!%p148_p9), 0   ;;  %v4290_v17 = vld [vmem:[%s5967_s1] ss:$0 sm:$0xff] (!%p148_p9)  ;;  %v4205_v50 = vmov (!%p148_p9), 683565275  }
  0x10   : > { %151 = sbr.rel (%p148_p9) target bundleno = 654 (0x28e), region = 28  ;;  %4041 = vset.pattern.permute.xlu1 (!%p148_p9), %v4204_v0  ;;  %4040 = vset.pattern.permute.xlu0 (!%p148_p9), %v4204_v0  ;;  %p177_p10 = scmp.lt.s32.totalorder (!%p148_p9), %s3782_s24, 31  ;;  %v4206_v54 = vmov (!%p148_p9), 2475754826   ;;  %v4207_v56 = vmov (!%p148_p9), 2131351028  }
  0x11   : > { %v4208_v58 = vmov (!%p148_p9), 2102212464   ;;  %v4209_v60 = vmov (!%p148_p9), 920167782   ;;  %s4537_s4 = sand.u32 (!%p148_p9), 1, %s4194_s13   ;;  %s3921_s17 = sshll.u32 (!%p148_p9), %s4256_s16, 11 }
  0x12   : > { %s3780_s5 = sshll.u32 (!%p148_p9), %s4537_s4, 7  ;;  %s5881_s16 = scalar_lea.hbm (!%p148_p9), %s5968_s2, %s3921_s17 }
  0x13   : > { %s4601_s6 = scalar_lea.vmem (!%p148_p9), [#allocation2], %s3780_s5  ;;  %s4606_s7 = scalar_lea.vmem (!%p148_p9), [#allocation4], %s3780_s5 }
  0x14   : > { %s3666_s19 = sshll.u32 (!%p148_p9), %s4601_s6, 4  ;;  %s3682_s20 = sshll.u32 (!%p148_p9), %s4606_s7, 4  ;;  %s5883_s19 = int_to_ptr.vmem [resolvable:$true] %s3666_s19  ;;  %s5891_s20 = int_to_ptr.vmem [resolvable:$true] %s3682_s20 }
  0x15   : > { %s3648_s29 = scalar_lea.sflag (!%p148_p9), [#allocation3], %s4537_s4  ;;  %s4108_s30 = scalar_lea.vmem (!%p148_p9), %s5883_s19, 2048 }
  0x16   : > { %p4109_p11 = scmp.ne.s32.totalorder (!%p148_p9), %s5883_s19, %s4108_s30  ;;  %s4211_s5 = smov (!%p148_p9), [#allocation2]  }
  0x17   : > { %s6005_s24 = smov (!%p177_p10, %s3782_s24), 31  ;;  %s4112_s8 = sshll.u32 %s4211_s5, 4  ;;  %s4113_s8 = int_to_ptr.vmem [resolvable:$false] %s4112_s8 }
  0x18   : > { %s3783_s25 = sshll.u32 %s6005_s24, 3  ;;  %p4110_p12 = pnand %p4109_p11, %p4273_p5 }
  0x19   : > { %s180_s28 = scalar_lea.vmem %s5966_s0, %s3783_s25  ;;  %s4114_s9 = scalar_lea.vmem %s4113_s8, 4096 }
  0x1a   : > { %v186_v1 = vld [vmem:[%s180_s28 + $0x10] sm:$0xff]  ;;  %v184_v2 = vld [vmem:[%s180_s28] sm:$0xff]  ;;  %v187_v3 = vld [vmem:[%s180_s28 + $0x18] sm:$0xff]  ;;  %p4111_p13 = pneg %p4110_p12  ;;  %p4115_p0 = scmp.lt.s32.totalorder %s5883_s19, %s4113_s8 }
  0x1b   : > { %213 = vperm.xlu1 %4041, %v186_v1   ;;  %203 = vperm.xlu0 %4040, %v184_v2   ;;  %v185_v4 = vld [vmem:[%s180_s28 + $0x8] sm:$0xff]  ;;  %v188_v6 = vld [vmem:[%s180_s28 + $0x20] sm:$0xff]  ;;  %v191_v7 = vld [vmem:[%s180_s28 + $0x38] sm:$0xff]  ;;  %p4116_p1 = scmp.lt.s32.totalorder %s4114_s9, %s4108_s30 }
  0x1c   : > { %v189_v5 = vld [vmem:[%s180_s28 + $0x28] sm:$0xff]  ;;  %v190_v8 = vld [vmem:[%s180_s28 + $0x30] sm:$0xff]  ;;  %v192_v10 = vld [vmem:[%s180_s28 + $0x40] sm:$0xff] }
  0x1d   : > { %v193_v9 = vld [vmem:[%s180_s28 + $0x48] sm:$0xff]  ;;  %v195_v11 = vld [vmem:[%s180_s28 + $0x58] sm:$0xff]  ;;  %v194_v12 = vld [vmem:[%s180_s28 + $0x50] sm:$0xff]  ;;  %p4117_p2 = por %p4116_p1, %p4115_p0 }
  0x1e   : > { %v197_v13 = vld [vmem:[%s180_s28 + $0x68] sm:$0xff]  ;;  %v196_v14 = vld [vmem:[%s180_s28 + $0x60] sm:$0xff]  ;;  %v199_v15 = vld [vmem:[%s180_s28 + $0x78] sm:$0xff] }
  0x1f   : > { %218 = vperm.xlu1 %4041, %v187_v3   ;;  %208 = vperm.xlu0 %4040, %v185_v4   ;;  %v198_v16 = vld [vmem:[%s180_s28 + $0x70] sm:$0xff]  ;;  %v4210_v3 = vmov 1326507024   ;;  %s5889_s28 = scalar_lea.hbm %s5969_s3, %s3921_s17  ;;  %p4118_p3 = pnand %p4117_p2, %p4111_p13 }
  0x23   : > { %228 = vperm.xlu1 %4041, %v189_v5   ;;  %223 = vperm.xlu0 %4040, %v188_v6  }
  0x27   : > { %238 = vperm.xlu1 %4041, %v191_v7   ;;  %233 = vperm.xlu0 %4040, %v190_v8  }
  0x2b   : > { %248 = vperm.xlu1 %4041, %v193_v9   ;;  %243 = vperm.xlu0 %4040, %v192_v10  }
  0x2f   : > { %258 = vperm.xlu1 %4041, %v195_v11   ;;  %253 = vperm.xlu0 %4040, %v194_v12  }
  0x33   : > { %268 = vperm.xlu1 %4041, %v197_v13   ;;  %263 = vperm.xlu0 %4040, %v196_v14  }
  0x37   : > { %278 = vperm.xlu1 %4041, %v199_v15   ;;  %273 = vperm.xlu0 %4040, %v198_v16  }
  0x9a   : > { %v214_v18 = vpop.permute.xlu1 %213  ;;  %v204_v19 = vpop.permute.xlu0 %203 }
  0x9b   : > { %v4293_v20 = vmul.f32 %v4290_v17, %v214_v18  ;;  %v4296_v21 = vmul.f32 %v4290_v17, %v204_v19 }
  0x9d   : > { %v509_v22 = vand.u32 2147483647, %v4293_v20  ;;  %v512_v23 = vand.u32 2139095040, %v4293_v20  ;;  %v303_v24 = vand.u32 2147483647, %v4296_v21  ;;  %v306_v25 = vand.u32 2139095040, %v4296_v21 }
  0x9e   : > { %v219_v26 = vpop.permute.xlu1 %218  ;;  %vm511_vm14 = vcmp.lt.s32.totalorder %v4293_v20, 0 }
  0x9f   : > { %v513_v27 = vshrl.u32 %v512_v23, 23  ;;  %v4303_v28 = vmul.f32 %v4290_v17, %v219_v26  ;;  %v516_v29 = vand.u32 8388607, %v509_v22  ;;  %v307_v30 = vshrl.u32 %v306_v25, 23 }
  0xa0   : > { %v310_v31 = vand.u32 8388607, %v303_v24  ;;  %vm4393_vm13 = vcmp.le.f32.partialorder %v509_v22, 0.7853982 }
  0xa1   : > { %v3793_v32 = vadd.s32 4294967169, %v513_v27  ;;  %v3785_v33 = vadd.s32 4294967169, %v307_v30  ;;  %v615_v34 = vand.u32 2139095040, %v4303_v28  ;;  %v517_v36 = vor.u32 8388608, %v516_v29 }
  0xa2   : > { %v311_v37 = vor.u32 8388608, %v310_v31  ;;  %v612_v48 = vand.u32 2147483647, %v4303_v28 }
  0xa3   : > { %v519_v35 = vadd.s32 1, %v3793_v32  ;;  %v313_v38 = vadd.s32 1, %v3785_v33  ;;  %v616_v39 = vshrl.u32 %v615_v34, 23  ;;  %v4310_v45 = vshll.u32 %v517_v36, 8 }
  0xa4   : > { %v4314_v47 = vshll.u32 %v311_v37, 8 }
  0xa5   : > { %vm520_vm0 = vcmp.gt.s32.totalorder %v519_v35, 0  ;;  %vm314_vm1 = vcmp.gt.s32.totalorder %v313_v38, 0  ;;  %v3797_v41 = vadd.s32 4294967169, %v616_v39 }
  0xa6   : > { %v521_v40 = vsel %vm520_vm0, %v519_v35, 0  ;;  %v315_v44 = vsel %vm314_vm1, %v313_v38, 0  ;;  %vm305_vm0 = vcmp.lt.s32.totalorder %v4296_v21, 0 }
  0xa7   : > { %v522_v42 = vshrl.u32 %v521_v40, 5  ;;  %v523_v43 = vand.u32 31, %v521_v40  ;;  %v4312_v46 = vshrl.u32 %v315_v44, 5  ;;  %v317_v52 = vand.u32 31, %v315_v44 }
  0xa8   : > { %v4318_v53 = vadd.s32 1, %v3797_v41 }
  0xa9   : > { %v524_v49 = vsub.s32 32, %v523_v43  ;;  %v526_v51 = vshll.u32 %v4205_v50, %v523_v43  ;;  %v529_v55 = vshll.u32 %v4206_v54, %v523_v43  ;;  %v532_v57 = vshll.u32 %v4207_v56, %v523_v43 }
  0xaa   : > { %v535_v59 = vshll.u32 %v4208_v58, %v523_v43  ;;  %v538_v61 = vshll.u32 %v4209_v60, %v523_v43  ;;  %vm541_vm2 = vcmp.lt.s32.totalorder %v522_v42, 1  ;;  %vm542_vm3 = vcmp.lt.s32.totalorder %v522_v42, 2 }
  0xab   : > { %v527_v62 = vshrl.u32 %v4206_v54, %v524_v49  ;;  %v530_v63 = vshrl.u32 %v4207_v56, %v524_v49  ;;  %v533_v0 = vshrl.u32 %v4208_v58, %v524_v49  ;;  %v525_v1 = vshrl.u32 %v4205_v50, %v524_v49 }
  0xac   : > { %v536_v2 = vshrl.u32 %v4209_v60, %v524_v49  ;;  %v539_v4 = vshrl.u32 %v4210_v3, %v524_v49  ;;  %v318_v8 = vsub.s32 32, %v317_v52  ;;  %vm543_vm4 = vcmp.lt.s32.totalorder %v522_v42, 3 }
  0xad   : > { %v528_v5 = vor.u32 %v527_v62, %v526_v51  ;;  %v531_v6 = vor.u32 %v530_v63, %v529_v55  ;;  %v534_v7 = vor.u32 %v533_v0, %v532_v57  ;;  %vm544_vm5 = vcmp.lt.s32.totalorder %v522_v42, 4 }
  0xae   : > { %v537_v9 = vor.u32 %v536_v2, %v535_v59  ;;  %v540_v10 = vor.u32 %v539_v4, %v538_v61  ;;  %v320_v19 = vshll.u32 %v4205_v50, %v317_v52  ;;  %v321_v26 = vshrl.u32 %v4206_v54, %v318_v8 }
  0xaf   : > { %v545_v11 = vsel %vm541_vm2, %v525_v1, %v528_v5  ;;  %v546_v12 = vsel %vm544_vm5, %v534_v7, 2102212464  ;;  %v549_v13 = vsel %vm541_vm2, %v528_v5, %v531_v6  ;;  %v553_v14 = vsel %vm541_vm2, %v531_v6, %v534_v7 }
  0xb0   : > { %v547_v15 = vsel %vm543_vm4, %v531_v6, %v546_v12  ;;  %v550_v16 = vsel %vm544_vm5, %v537_v9, 920167782  ;;  %v554_v18 = vsel %vm544_vm5, %v540_v10, 1326507024  ;;  %v323_v27 = vshll.u32 %v4206_v54, %v317_v52  ;;  %v209_v6 = vpop.permute.xlu0 %208 }
  0xb1   : > { %v551_v23 = vsel %vm543_vm4, %v534_v7, %v550_v16  ;;  %v555_v25 = vsel %vm543_vm4, %v537_v9, %v554_v18  ;;  %v548_v29 = vsel %vm542_vm3, %v545_v11, %v547_v15  ;;  %v324_v32 = vshrl.u32 %v4207_v56, %v318_v8 }
  0xb2   : > { %v552_v30 = vsel %vm542_vm3, %v549_v13, %v551_v23  ;;  %v556_v31 = vsel %vm542_vm3, %v553_v14, %v555_v25  ;;  %v322_v37 = vor.u32 %v321_v26, %v320_v19  ;;  %v326_v39 = vshll.u32 %v4207_v56, %v317_v52 }
  0xb3   : > { %v4341_v33 = vmul.u32.u64.low %v4310_v45, %v556_v31  ;;  %v4342_v34 = vmul.u32.u64.high %v4310_v45, %v556_v31, %v4341_v33  ;;  %v4345_v35 = vmul.u32.u64.low %v4310_v45, %v552_v30  ;;  %v4346_v36 = vmul.u32.u64.high %v4310_v45, %v552_v30, %v4345_v35 }
  0xb4   : > { %v325_v38 = vor.u32 %v324_v32, %v323_v27  ;;  %v327_v40 = vshrl.u32 %v4208_v58, %v318_v8  ;;  %v319_v41 = vshrl.u32 %v4205_v50, %v318_v8  ;;  %v329_v42 = vshll.u32 %v4208_v58, %v317_v52 }
  0xb5   : > { %v330_v43 = vshrl.u32 %v4209_v60, %v318_v8  ;;  %v333_v44 = vshrl.u32 %v4210_v3, %v318_v8  ;;  %v564_v49 = vmul.u32 %v4310_v45, %v548_v29  ;;  %v332_v55 = vshll.u32 %v4209_v60, %v317_v52 }
  0xb6   : > { %v328_v51 = vor.u32 %v327_v40, %v326_v39  ;;  %vm335_vm6 = vcmp.lt.s32.totalorder %v4312_v46, 1  ;;  %vm566_vm7 = vc.u32 %v4342_v34, %v4345_v35  ;;  %v567_v57 = vadd.s32 1, %v4346_v36 }
  0xb7   : > { %v331_v59 = vor.u32 %v330_v43, %v329_v42  ;;  %vm336_vm8 = vcmp.lt.s32.totalorder %v4312_v46, 2  ;;  %v334_v61 = vor.u32 %v333_v44, %v332_v55  ;;  %vm337_vm9 = vcmp.lt.s32.totalorder %v4312_v46, 3 }
  0xb8   : > { %vm338_vm10 = vcmp.lt.s32.totalorder %v4312_v46, 4  ;;  %v343_v62 = vsel %vm335_vm6, %v322_v37, %v325_v38  ;;  %v568_v45 = vsel %vm566_vm7, %v567_v57, %v4346_v36  ;;  %v347_v0 = vsel %vm335_vm6, %v325_v38, %v328_v51 }
  0xb9   : > { %v340_v63 = vsel %vm338_vm10, %v328_v51, 2102212464  ;;  %v344_v52 = vsel %vm338_vm10, %v331_v59, 920167782  ;;  %v569_v1 = vadd.s32 %v568_v45, %v564_v49  ;;  %v339_v2 = vsel %vm335_vm6, %v319_v41, %v322_v37 }
  0xba   : > { %v345_v4 = vsel %vm337_vm9, %v328_v51, %v344_v52  ;;  %v348_v5 = vsel %vm338_vm10, %v334_v61, 1326507024  ;;  %v341_v7 = vsel %vm337_vm9, %v325_v38, %v340_v63  ;;  %vm623_vm11 = vcmp.gt.s32.totalorder %v4318_v53, 0 }
  0xbb   : > { %v346_v8 = vsel %vm336_vm8, %v343_v62, %v345_v4  ;;  %v349_v9 = vsel %vm337_vm9, %v331_v59, %v348_v5  ;;  %v570_v10 = vadd.s32 536870912, %v569_v1  ;;  %v4379_v16 = vmul.f32 %v4290_v17, %v209_v6 }
  0xbc   : > { %v350_v11 = vsel %vm336_vm8, %v347_v0, %v349_v9  ;;  %v4371_v12 = vmul.u32.u64.low %v4314_v47, %v346_v8  ;;  %v4372_v13 = vmul.u32.u64.high %v4314_v47, %v346_v8, %v4371_v12  ;;  %v342_v19 = vsel %vm336_vm8, %v339_v2, %v341_v7 }
  0xbd   : > { %v4375_v14 = vmul.u32.u64.low %v4314_v47, %v350_v11  ;;  %v4376_v15 = vmul.u32.u64.high %v4314_v47, %v350_v11, %v4375_v14  ;;  %v571_v18 = vshrl.u32 %v570_v10, 30  ;;  %v624_v23 = vsel %vm623_vm11, %v4318_v53, 0 }
  0xbe   : > { %v361_v26 = vadd.s32 1, %v4372_v13  ;;  %v619_v27 = vand.u32 8388607, %v612_v48  ;;  %v358_v29 = vmul.u32 %v4314_v47, %v342_v19  ;;  %v409_v30 = vand.u32 2139095040, %v4379_v16 }
  0xbf   : > { %v572_v25 = vshll.u32 %v571_v18, 30  ;;  %vm360_vm12 = vc.u32 %v4376_v15, %v4371_v12  ;;  %v626_v33 = vand.u32 31, %v624_v23  ;;  %v595_v40 = vsub.s32 4, %v571_v18 }
  0xc0   : > { %v362_v32 = vsel %vm360_vm12, %v361_v26, %v4372_v13  ;;  %v620_v37 = vor.u32 8388608, %v619_v27  ;;  %v410_v38 = vshrl.u32 %v409_v30, 23  ;;  %v406_v43 = vand.u32 2147483647, %v4379_v16 }
  0xc1   : > { %v573_v31 = vsub.s32 %v569_v1, %v572_v25  ;;  %v363_v46 = vadd.s32 %v362_v32, %v358_v29  ;;  %v627_v41 = vsub.s32 32, %v626_v33  ;;  %v565_v44 = vadd.s32 %v4345_v35, %v4342_v34 }
  0xc2   : > { %v4403_v51 = vshrl.u32 %v624_v23, 5  ;;  %v4405_v55 = vshll.u32 %v620_v37, 8  ;;  %v4408_v57 = vadd.s32 %v4371_v12, %v4376_v15  ;;  %v629_v59 = vshll.u32 %v4205_v50, %v626_v33 }
  0xc3   : > { %v575_v36 = vsub.s32 0, %v573_v31  ;;  %v364_v53 = vadd.s32 536870912, %v363_v46  ;;  %v3789_v61 = vadd.s32 4294967169, %v410_v38  ;;  %v596_v45 = vsel %vm511_vm14, %v595_v40, %v571_v18 }
  0xc4   : > { %v632_v63 = vshll.u32 %v4206_v54, %v626_v33  ;;  %v639_v34 = vshrl.u32 %v4209_v60, %v627_v41  ;;  %v630_v52 = vshrl.u32 %v4206_v54, %v627_v41  ;;  %v633_v0 = vshrl.u32 %v4207_v56, %v627_v41 }
  0xc5   : > { %v3794_v39 = vmin.u32 %v575_v36, %v573_v31  ;;  %v4398_v42 = vshrl.u32 %v364_v53, 30  ;;  %v636_v1 = vshrl.u32 %v4208_v58, %v627_v41  ;;  %v628_v2 = vshrl.u32 %v4205_v50, %v627_v41 }
  0xc6   : > { %v638_v4 = vshll.u32 %v4208_v58, %v626_v33  ;;  %v642_v5 = vshrl.u32 %v4210_v3, %v627_v41  ;;  %v4426_v7 = vsel %vm4393_vm13, 0, %v596_v45  ;;  %v635_v9 = vshll.u32 %v4207_v56, %v626_v33 }
  0xc7   : > { %v577_v49 = vclz %v3794_v39  ;;  %v366_v22 = vshll.u32 %v4398_v42, 30  ;;  %v641_v13 = vshll.u32 %v4209_v60, %v626_v33  ;;  %v631_v15 = vor.u32 %v630_v52, %v629_v59 }
  0xc8   : > { %v640_v12 = vor.u32 %v639_v34, %v638_v4  ;;  %v634_v18 = vor.u32 %v633_v0, %v632_v63  ;;  %v637_v19 = vor.u32 %v636_v1, %v635_v9  ;;  %v389_v30 = vsub.s32 4, %v4398_v42 }
  0xc9   : > { %v3795_v62 = vadd.s32 4294967294, %v577_v49  ;;  %v4416_v35 = vsub.s32 %v363_v46, %v366_v22  ;;  %v643_v27 = vor.u32 %v642_v5, %v641_v13  ;;  %vm644_vm1 = vcmp.lt.s32.totalorder %v4403_v51, 1 }
  0xca   : > { %vm647_vm2 = vcmp.lt.s32.totalorder %v4403_v51, 4  ;;  %vm645_vm3 = vcmp.lt.s32.totalorder %v4403_v51, 2  ;;  %vm646_vm4 = vcmp.lt.s32.totalorder %v4403_v51, 3  ;;  %v656_v37 = vsel %vm644_vm1, %v634_v18, %v637_v19 }
  0xcb   : > { %vm3796_vm15 = vcmp.lt.s32.totalorder %v3795_v62, 0  ;;  %v369_v8 = vsub.s32 0, %v4416_v35  ;;  %v653_v46 = vsel %vm647_vm2, %v640_v12, 920167782  ;;  %vm4444_vm5 = vcmp.le.f32.partialorder %v303_v24, 0.7853982 }
  0xcc   : > { %v580_v6 = vsel %vm3796_vm15, 0, %v3795_v62  ;;  %v649_v39 = vsel %vm647_vm2, %v637_v19, 2102212464  ;;  %v654_v40 = vsel %vm646_vm4, %v637_v19, %v653_v46  ;;  %v657_v41 = vsel %vm647_vm2, %v643_v27, 1326507024 }
  0xcd   : > { %v581_v10 = vsub.s32 32, %v580_v6  ;;  %v585_v11 = vsub.s32 4294967266, %v580_v6  ;;  %v3786_v14 = vmin.u32 %v369_v8, %v4416_v35  ;;  %v582_v23 = vshll.u32 %v573_v31, %v580_v6 }
  0xce   : > { %v652_v31 = vsel %vm644_vm1, %v631_v15, %v634_v18  ;;  %v648_v49 = vsel %vm644_vm1, %v628_v2, %v631_v15  ;;  %v658_v22 = vsel %vm646_vm4, %v640_v12, %v657_v41  ;;  %v650_v52 = vsel %vm646_vm4, %v634_v18, %v649_v39 }
  0xcf   : > { %v583_v25 = vshrl.u32 %v565_v44, %v581_v10  ;;  %v586_v26 = vadd.s32 127, %v585_v11  ;;  %v371_v29 = vclz %v3786_v14  ;;  %v655_v24 = vsel %vm645_vm3, %v652_v31, %v654_v40 }
  0xd0   : > { %v659_v45 = vsel %vm645_vm3, %v656_v37, %v658_v22  ;;  %v416_v0 = vadd.s32 1, %v3789_v61  ;;  %v4467_v9 = vmul.u32.u64.low %v4405_v55, %v655_v24  ;;  %v4468_v10 = vmul.u32.u64.high %v4405_v55, %v655_v24, %v4467_v9 }
  0xd1   : > { %v584_v32 = vor.u32 %v583_v25, %v582_v23  ;;  %v587_v33 = vshll.u32 %v586_v26, 23  ;;  %v3787_v36 = vadd.s32 4294967294, %v371_v29  ;;  %v2268_v12 = vadd.s32 3, %v4426_v7  ;;  %v229_v26 = vpop.permute.xlu1 %228 }
  0xd2   : > { %v4462_v4 = vmul.u32.u64.low %v4405_v55, %v659_v45  ;;  %v4463_v5 = vmul.u32.u64.high %v4405_v55, %v659_v45, %v4462_v4  ;;  %v390_v61 = vsel %vm305_vm0, %v389_v30, %v4398_v42  ;;  %vm417_vm7 = vcmp.gt.s32.totalorder %v416_v0, 0 }
  0xd3   : > { %v588_v53 = vor.u32 4788187, %v587_v33  ;;  %v591_v44 = vcvt.s32.f32 %v584_v32  ;;  %vm3788_vm6 = vcmp.lt.s32.totalorder %v3787_v36, 0  ;;  %v651_v14 = vsel %vm645_vm3, %v648_v49, %v650_v52 }
  0xd4   : > { %v374_v62 = vsel %vm3788_vm6, 0, %v3787_v36  ;;  %v4480_v18 = vand.u32 3, %v4426_v7  ;;  %vm669_vm8 = vc.u32 %v4463_v5, %v4467_v9  ;;  %v4486_v19 = vand.u32 8388607, %v406_v43 }
  0xd5   : > { %v589_v59 = vand.u32 2147483647, %v588_v53  ;;  %v375_v63 = vsub.s32 32, %v374_v62  ;;  %v379_v34 = vsub.s32 4294967266, %v374_v62  ;;  %v376_v2 = vshll.u32 %v4416_v35, %v374_v62 }
  0xd6   : > { %v392_v23 = vsel %vm4444_vm5, 0, %v390_v61  ;;  %v670_v25 = vadd.s32 1, %v4468_v10  ;;  %v4494_v7 = vand.u32 3, %v2268_v12  ;;  %v667_v27 = vmul.u32 %v4405_v55, %v651_v14 }
  0xd7   : > { %v592_v1 = vmul.f32 %v591_v44, %v589_v59  ;;  %v377_v6 = vshrl.u32 %v4408_v57, %v375_v63  ;;  %v380_v8 = vadd.s32 127, %v379_v34  ;;  %v418_v57 = vsel %vm417_vm7, %v416_v0, 0 }
  0xd8   : > { %v420_v29 = vand.u32 31, %v418_v57  ;;  %v671_v33 = vsel %vm669_vm8, %v670_v25, %v4468_v10  ;;  %v2060_v47 = vadd.s32 3, %v392_v23  ;;  %v4501_v31 = vmul.f32 %v4290_v17, %v229_v26 }
  0xd9   : > { %v593_v11 = vxor.u32 2147483648, %v592_v1  ;;  %v378_v35 = vor.u32 %v377_v6, %v376_v2  ;;  %v381_v13 = vshll.u32 %v380_v8, 23  ;;  %v672_v46 = vadd.s32 %v671_v33, %v667_v27 }
  0xda   : > { %v4498_v36 = vsub.s32 32, %v420_v29  ;;  %v4503_v53 = vshrl.u32 %v418_v57, 5  ;;  %v423_v39 = vshll.u32 %v4205_v50, %v420_v29  ;;  %v426_v55 = vshll.u32 %v4206_v54, %v420_v29 }
  0xdb   : > { %v594_v15 = vsel %vm511_vm14, %v593_v11, %v592_v1  ;;  %v382_v51 = vor.u32 4788187, %v381_v13  ;;  %v385_v32 = vcvt.s32.f32 %v378_v35  ;;  %vm607_vm9 = vcmp.eq.s32.totalorder %v4480_v18, 2 }
  0xdc   : > { %v597_v42 = vsel %vm4393_vm13, %v4293_v20, %v594_v15  ;;  %v673_v40 = vadd.s32 536870912, %v672_v46  ;;  %v424_v41 = vshrl.u32 %v4206_v54, %v4498_v36  ;;  %v427_v44 = vshrl.u32 %v4207_v56, %v4498_v36 }
  0xdd   : > { %4042 = vcosq.f32 %v597_v42  ;;  %v383_v30 = vand.u32 2147483647, %v382_v51  ;;  %v429_v49 = vshll.u32 %v4207_v56, %v420_v29  ;;  %vm604_vm10 = vcmp.eq.s32.totalorder %v4480_v18, 0 }
  0xde   : > { %4044 = vsinq.f32 %v597_v42  ;;  %vm2271_vm11 = vcmp.eq.s32.totalorder %v4494_v7, 0  ;;  %v430_v59 = vshrl.u32 %v4208_v58, %v4498_v36  ;;  %v432_v62 = vshll.u32 %v4208_v58, %v420_v29 }
  0xdf   : > { %v386_v37 = vmul.f32 %v385_v32, %v383_v30  ;;  %v433_v24 = vshrl.u32 %v4209_v60, %v4498_v36  ;;  %vm603_vm12 = vcmp.lt.s32.totalorder %v4480_v18, 2  ;;  %vm2270_vm13 = vcmp.lt.s32.totalorder %v4494_v7, 2 }
  0xe0   : > { %vm2274_vm14 = vcmp.eq.s32.totalorder %v4494_v7, 2  ;;  %v4523_v45 = vand.u32 3, %v392_v23  ;;  %v4525_v63 = vshrl.u32 %v673_v40, 30  ;;  %v4527_v34 = vor.u32 %v424_v41, %v423_v39 }
  0xe1   : > { %v387_v22 = vxor.u32 2147483648, %v386_v37  ;;  %vm601_vm15 = vweird.f32 %v4293_v20  ;;  %v4532_v0 = vor.u32 %v427_v44, %v426_v55  ;;  %v431_v1 = vor.u32 %v430_v59, %v429_v49 }
  0xe2   : > { %v4534_v2 = vor.u32 %v433_v24, %v432_v62  ;;  %v675_v6 = vshll.u32 %v4525_v63, 30  ;;  %v414_v8 = vor.u32 8388608, %v4486_v19  ;;  %vm441_vm1 = vcmp.lt.s32.totalorder %v4503_v53, 4 }
  0xe3   : > { %v388_v52 = vsel %vm305_vm0, %v387_v22, %v386_v37  ;;  %v4545_v10 = vand.u32 3, %v2060_v47  ;;  %v436_v11 = vshrl.u32 %v4210_v3, %v4498_v36  ;;  %vm614_vm0 = vcmp.lt.s32.totalorder %v4303_v28, 0 }
  0xe4   : > { %v391_v4 = vsel %vm4444_vm5, %v4296_v21, %v388_v52  ;;  %v447_v12 = vsel %vm441_vm1, %v4534_v2, 920167782  ;;  %v4553_v38 = vsub.s32 %v672_v46, %v675_v6  ;;  %vm438_vm2 = vcmp.lt.s32.totalorder %v4503_v53, 1 }
  0xe5   : > { %4046 = vcosq.f32 %v391_v4  ;;  %vm440_vm3 = vcmp.lt.s32.totalorder %v4503_v53, 3  ;;  %v435_v14 = vshll.u32 %v4209_v60, %v420_v29  ;;  %v446_v57 = vsel %vm438_vm2, %v4527_v34, %v4532_v0 }
  0xe6   : > { %4048 = vsinq.f32 %v391_v4  ;;  %v448_v15 = vsel %vm440_vm3, %v431_v1, %v447_v12  ;;  %v678_v42 = vsub.s32 0, %v4553_v38  ;;  %v4566_v51 = vshll.u32 %v414_v8, 8 }
  0xe7   : > { %v4043_v61 = vpop.eup %4042  ;;  %v821_v23 = vand.u32 2139095040, %v4501_v31  ;;  %vm401_vm4 = vcmp.eq.s32.totalorder %v4523_v45, 2  ;;  %v437_v27 = vor.u32 %v436_v11, %v435_v14  ;;  %vm439_vm5 = vcmp.lt.s32.totalorder %v4503_v53, 2 }
  0xe8   : > { %v4045_v35 = vpop.eup %4044  ;;  %v608_v13 = vxor.u32 2147483648, %v4043_v61  ;;  %vm398_vm6 = vcmp.eq.s32.totalorder %v4523_v45, 0  ;;  %v3798_v32 = vmin.u32 %v678_v42, %v4553_v38  ;;  %v449_v33 = vsel %vm439_vm5, %v446_v57, %v448_v15 }
  0xe9   : > { %v605_v19 = vxor.u32 2147483648, %v4045_v35  ;;  %vm397_vm7 = vcmp.lt.s32.totalorder %v4523_v45, 2  ;;  %vm2062_vm8 = vcmp.lt.s32.totalorder %v4545_v10, 2  ;;  %v698_v37 = vsub.s32 4, %v4525_v63 }
  0xea   : > { %v609_v25 = vsel %vm607_vm9, %v608_v13, %v4045_v35  ;;  %v2276_v26 = vsel %vm2274_vm14, %v608_v13, %v4045_v35  ;;  %v422_v39 = vshrl.u32 %v4205_v50, %v4498_v36  ;;  %vm395_vm9 = vweird.f32 %v4296_v21 }
  0xeb   : > { %v606_v29 = vsel %vm604_vm10, %v4043_v61, %v605_v19  ;;  %v2273_v30 = vsel %vm2271_vm11, %v4043_v61, %v605_v19  ;;  %v680_v18 = vclz %v3798_v32  ;;  %v443_v7 = vsel %vm441_vm1, %v431_v1, 2102212464 }
  0xec   : > { %v610_v47 = vsel %vm603_vm12, %v606_v29, %v609_v25  ;;  %v2277_v46 = vsel %vm2270_vm13, %v2273_v30, %v2276_v26  ;;  %v450_v20 = vsel %vm438_vm2, %v4532_v0, %v431_v1  ;;  %v451_v36 = vsel %vm441_vm1, %v437_v27, 1326507024 }
  0xed   : > { %v611_v55 = vsel %vm601_vm15, nan, %v610_v47  ;;  %v2278_v40 = vsel %vm601_vm15, nan, %v2277_v46  ;;  %v4615_v41 = vmul.u32.u64.low %v4566_v51, %v449_v33  ;;  %v4616_v44 = vmul.u32.u64.high %v4566_v51, %v449_v33, %v4615_v41 }
  0xee   : > { %1953 = vst [vmem:[%s4601_s6 + $0x10] sm:$0xff] %v611_v55  ;;  %3633 = vst [vmem:[%s4606_s7 + $0x10] sm:$0xff] %v2278_v40  ;;  %vm2063_vm10 = vcmp.eq.s32.totalorder %v4545_v10, 0  ;;  %vm2066_vm11 = vcmp.eq.s32.totalorder %v4545_v10, 2  ;;  %vm4623_vm12 = vcmp.le.f32.partialorder %v612_v48, 0.7853982  ;;  %v668_v22 = vadd.s32 %v4467_v9, %v4463_v5 }
  0xef   : > { %v3799_v59 = vadd.s32 4294967294, %v680_v18  ;;  %v4047_v62 = vpop.eup %4046  ;;  %v699_v24 = vsel %vm614_vm0, %v698_v37, %v4525_v63  ;;  %v442_v52 = vsel %vm438_vm2, %v422_v39, %v4527_v34  ;;  %v444_v48 = vsel %vm440_vm3, %v4532_v0, %v443_v7 }
  0xf0   : > { %v452_v1 = vsel %vm440_vm3, %v4534_v2, %v451_v36  ;;  %v4049_v4 = vpop.eup %4048  ;;  %v402_v5 = vxor.u32 2147483648, %v4047_v62  ;;  %v822_v6 = vshrl.u32 %v821_v23, 23  ;;  %v445_v61 = vsel %vm439_vm5, %v442_v52, %v444_v48 }
  0xf1   : > { %vm3800_vm13 = vcmp.lt.s32.totalorder %v3799_v59, 0  ;;  %v453_v9 = vsel %vm439_vm5, %v450_v20, %v452_v1  ;;  %v399_v63 = vxor.u32 2147483648, %v4049_v4  ;;  %v464_v57 = vadd.s32 1, %v4616_v44 }
  0xf2   : > { %v683_v8 = vsel %vm3800_vm13, 0, %v3799_v59  ;;  %v4644_v11 = vmul.u32.u64.low %v4566_v51, %v453_v9  ;;  %v4645_v34 = vmul.u32.u64.high %v4566_v51, %v453_v9, %v4644_v11  ;;  %v403_v0 = vsel %vm401_vm4, %v402_v5, %v4049_v4 }
  0xf3   : > { %v2068_v2 = vsel %vm2066_vm11, %v402_v5, %v4049_v4  ;;  %v684_v12 = vsub.s32 32, %v683_v8  ;;  %v400_v35 = vsel %vm398_vm6, %v4047_v62, %v399_v63  ;;  %v2065_v13 = vsel %vm2063_vm10, %v4047_v62, %v399_v63 }
  0xf4   : > { %v688_v14 = vsub.s32 4294967266, %v683_v8  ;;  %v404_v15 = vsel %vm397_vm7, %v400_v35, %v403_v0  ;;  %v2069_v19 = vsel %vm2062_vm8, %v2065_v13, %v2068_v2  ;;  %v3805_v23 = vadd.s32 4294967169, %v822_v6 }
  0xf5   : > { %v686_v42 = vshrl.u32 %v668_v22, %v684_v12  ;;  %v405_v53 = vsel %vm395_vm9, nan, %v404_v15  ;;  %v2070_v25 = vsel %vm395_vm9, nan, %v2069_v19  ;;  %v685_v26 = vshll.u32 %v4553_v38, %v683_v8  ;;  %v224_v38 = vpop.permute.xlu0 %223 }
  0xf6   : > { %v689_v27 = vadd.s32 127, %v688_v14  ;;  %1951 = vst [vmem:[%s4601_s6] sm:$0xff] %v405_v53  ;;  %3631 = vst [vmem:[%s4606_s7] sm:$0xff] %v2070_v25  ;;  %v461_v29 = vmul.u32 %v4566_v51, %v445_v61  ;;  %vm463_vm14 = vc.u32 %v4645_v34, %v4615_v41  ;;  %v818_v45 = vand.u32 2147483647, %v4501_v31 }
  0xf7   : > { %v828_v10 = vadd.s32 1, %v3805_v23  ;;  %v687_v30 = vor.u32 %v686_v42, %v685_v26  ;;  %v701_v33 = vsel %vm4623_vm12, 0, %v699_v24  ;;  %v465_v21 = vsel %vm463_vm14, %v464_v57, %v4616_v44 }
  0xf8   : > { %v690_v32 = vshll.u32 %v689_v27, 23  ;;  %v466_v47 = vadd.s32 %v465_v21, %v461_v29  ;;  %v2372_v39 = vadd.s32 3, %v701_v33  ;;  %v825_v55 = vand.u32 8388607, %v818_v45 }
  0xf9   : > { %vm829_vm15 = vcmp.gt.s32.totalorder %v828_v10, 0  ;;  %v694_v7 = vcvt.s32.f32 %v687_v30  ;;  %v4679_v20 = vmul.f32 %v4290_v17, %v224_v38  ;;  %v4681_v44 = vand.u32 3, %v701_v33 }
  0xfa   : > { %v691_v46 = vor.u32 4788187, %v690_v32  ;;  %v830_v37 = vsel %vm829_vm15, %v828_v10, 0  ;;  %v467_v51 = vadd.s32 536870912, %v466_v47  ;;  %v4683_v62 = vand.u32 3, %v2372_v39 }
  0xfb   : > { %v832_v40 = vand.u32 31, %v830_v37  ;;  %v826_v52 = vor.u32 8388608, %v825_v55  ;;  %v718_v5 = vand.u32 2139095040, %v4679_v20  ;;  %v4690_v6 = vshrl.u32 %v830_v37, 5 }
  0xfc   : > { %v692_v18 = vand.u32 2147483647, %v691_v46  ;;  %v468_v36 = vshrl.u32 %v467_v51, 30  ;;  %vm408_vm1 = vcmp.lt.s32.totalorder %v4379_v16, 0  ;;  %v462_v25 = vadd.s32 %v4615_v41, %v4645_v34 }
  0xfd   : > { %v833_v22 = vsub.s32 32, %v832_v40  ;;  %v835_v0 = vshll.u32 %v4205_v50, %v832_v40  ;;  %v838_v2 = vshll.u32 %v4206_v54, %v832_v40  ;;  %v841_v13 = vshll.u32 %v4207_v56, %v832_v40 }
  0xfe   : > { %v695_v59 = vmul.f32 %v694_v7, %v692_v18  ;;  %v469_v24 = vshll.u32 %v468_v36, 30  ;;  %v844_v14 = vshll.u32 %v4208_v58, %v832_v40  ;;  %v847_v19 = vshll.u32 %v4209_v60, %v832_v40 }
  0xff   : > { %v836_v1 = vshrl.u32 %v4206_v54, %v833_v22  ;;  %v839_v4 = vshrl.u32 %v4207_v56, %v833_v22  ;;  %v842_v63 = vshrl.u32 %v4208_v58, %v833_v22  ;;  %v845_v8 = vshrl.u32 %v4209_v60, %v833_v22 }
 0x100   : > { %v696_v48 = vxor.u32 2147483648, %v695_v59  ;;  %v4688_v9 = vsub.s32 %v466_v47, %v469_v24  ;;  %v848_v12 = vshrl.u32 %v4210_v3, %v833_v22  ;;  %v715_v27 = vand.u32 2147483647, %v4679_v20 }
 0x101   : > { %v837_v57 = vor.u32 %v836_v1, %v835_v0  ;;  %v840_v15 = vor.u32 %v839_v4, %v838_v2  ;;  %v843_v23 = vor.u32 %v842_v63, %v841_v13  ;;  %v846_v53 = vor.u32 %v845_v8, %v844_v14 }
 0x102   : > { %v697_v11 = vsel %vm614_vm0, %v696_v48, %v695_v59  ;;  %v472_v35 = vsub.s32 0, %v4688_v9  ;;  %vm4709_vm0 = vcmp.le.f32.partialorder %v406_v43, 0.7853982  ;;  %v849_v26 = vor.u32 %v848_v12, %v847_v19 }
 0x103   : > { %v700_v61 = vsel %vm4623_vm12, %v4303_v28, %v697_v11  ;;  %v719_v29 = vshrl.u32 %v718_v5, 23  ;;  %v492_v30 = vsub.s32 4, %v468_v36  ;;  %vm850_vm2 = vcmp.lt.s32.totalorder %v4690_v6, 1 }
 0x104   : > { %4050 = vcosq.f32 %v700_v61  ;;  %v3790_v49 = vmin.u32 %v472_v35, %v4688_v9  ;;  %v4718_v32 = vshll.u32 %v826_v52, 8  ;;  %vm710_vm3 = vcmp.eq.s32.totalorder %v4681_v44, 2 }
 0x105   : > { %4052 = vsinq.f32 %v700_v61  ;;  %vm2378_vm4 = vcmp.eq.s32.totalorder %v4683_v62, 2  ;;  %v834_v43 = vshrl.u32 %v4205_v50, %v833_v22  ;;  %vm851_vm5 = vcmp.lt.s32.totalorder %v4690_v6, 2 }
 0x106   : > { %v474_v10 = vclz %v3790_v49  ;;  %vm853_vm6 = vcmp.lt.s32.totalorder %v4690_v6, 4  ;;  %v858_v41 = vsel %vm850_vm2, %v837_v57, %v840_v15  ;;  %vm707_vm7 = vcmp.eq.s32.totalorder %v4681_v44, 0 }
 0x107   : > { %vm2375_vm8 = vcmp.eq.s32.totalorder %v4683_v62, 0  ;;  %vm852_vm9 = vcmp.lt.s32.totalorder %v4690_v6, 3  ;;  %v859_v33 = vsel %vm853_vm6, %v846_v53, 920167782  ;;  %v862_v21 = vsel %vm850_vm2, %v840_v15, %v843_v23 }
 0x108   : > { %v3791_v34 = vadd.s32 4294967294, %v474_v10  ;;  %vm706_vm10 = vcmp.lt.s32.totalorder %v4681_v44, 2  ;;  %vm2374_vm11 = vcmp.lt.s32.totalorder %v4683_v62, 2  ;;  %v855_v47 = vsel %vm853_vm6, %v843_v23, 2102212464 }
 0x109   : > { %v860_v38 = vsel %vm852_vm9, %v843_v23, %v859_v33  ;;  %v863_v46 = vsel %vm853_vm6, %v849_v26, 1326507024  ;;  %v3801_v37 = vadd.s32 4294967169, %v719_v29  ;;  %vm704_vm12 = vweird.f32 %v4303_v28  ;;  %v239_v29 = vpop.permute.xlu1 %238 }
 0x10a   : > { %vm3792_vm13 = vcmp.lt.s32.totalorder %v3791_v34, 0  ;;  %v493_v39 = vsel %vm408_vm1, %v492_v30, %v468_v36  ;;  %v861_v51 = vsel %vm851_vm5, %v858_v41, %v860_v38  ;;  %v864_v55 = vsel %vm852_vm9, %v846_v53, %v863_v46 }
 0x10b   : > { %v477_v40 = vsel %vm3792_vm13, 0, %v3791_v34  ;;  %v865_v18 = vsel %vm851_vm5, %v862_v21, %v864_v55  ;;  %v4746_v7 = vmul.u32.u64.low %v4718_v32, %v861_v51  ;;  %v4747_v22 = vmul.u32.u64.high %v4718_v32, %v861_v51, %v4746_v7 }
 0x10c   : > { %v478_v59 = vsub.s32 32, %v477_v40  ;;  %v482_v24 = vsub.s32 4294967266, %v477_v40  ;;  %v854_v36 = vsel %vm850_vm2, %v834_v43, %v837_v57  ;;  %v856_v52 = vsel %vm852_vm9, %v840_v15, %v855_v47 }
 0x10d   : > { %v495_v1 = vsel %vm4709_vm0, 0, %v493_v39  ;;  %v4757_v4 = vmul.u32.u64.low %v4718_v32, %v865_v18  ;;  %v4758_v5 = vmul.u32.u64.high %v4718_v32, %v865_v18, %v4757_v4  ;;  %v725_v63 = vadd.s32 1, %v3801_v37 }
 0x10e   : > { %v4051_v48 = vpop.eup %4050  ;;  %v479_v0 = vshll.u32 %v4688_v9, %v477_v40  ;;  %v480_v2 = vshrl.u32 %v462_v25, %v478_v59  ;;  %v483_v12 = vadd.s32 127, %v482_v24  ;;  %v857_v35 = vsel %vm851_vm5, %v854_v36, %v856_v52 }
 0x10f   : > { %v4053_v8 = vpop.eup %4052  ;;  %v711_v11 = vxor.u32 2147483648, %v4051_v48  ;;  %v876_v13 = vadd.s32 1, %v4747_v22  ;;  %vm726_vm14 = vcmp.gt.s32.totalorder %v725_v63, 0  ;;  %v2164_v49 = vadd.s32 3, %v495_v1 }
 0x110   : > { %v708_v61 = vxor.u32 2147483648, %v4053_v8  ;;  %v481_v15 = vor.u32 %v480_v2, %v479_v0  ;;  %v484_v19 = vshll.u32 %v483_v12, 23  ;;  %vm875_vm15 = vc.u32 %v4758_v5, %v4746_v7 }
 0x111   : > { %v712_v14 = vsel %vm710_vm3, %v711_v11, %v4053_v8  ;;  %v2380_v57 = vsel %vm2378_vm4, %v711_v11, %v4053_v8  ;;  %v873_v26 = vmul.u32 %v4718_v32, %v857_v35  ;;  %v877_v43 = vsel %vm875_vm15, %v876_v13, %v4747_v22 }
 0x112   : > { %v709_v9 = vsel %vm707_vm7, %v4051_v48, %v708_v61  ;;  %v2377_v6 = vsel %vm2375_vm8, %v4051_v48, %v708_v61  ;;  %v485_v25 = vor.u32 4788187, %v484_v19  ;;  %v727_v41 = vsel %vm726_vm14, %v725_v63, 0 }
 0x113   : > { %v713_v23 = vsel %vm706_vm10, %v709_v9, %v712_v14  ;;  %v2381_v53 = vsel %vm2374_vm11, %v2377_v6, %v2380_v57  ;;  %v488_v34 = vcvt.s32.f32 %v481_v15  ;;  %v878_v62 = vadd.s32 %v877_v43, %v873_v26 }
 0x114   : > { %v714_v10 = vsel %vm704_vm12, nan, %v713_v23  ;;  %v2382_v30 = vsel %vm704_vm12, nan, %v2381_v53  ;;  %v486_v44 = vand.u32 2147483647, %v485_v25  ;;  %v729_v33 = vand.u32 31, %v727_v41 }
 0x115   : > { %1954 = vst [vmem:[%s4601_s6 + $0x18] sm:$0xff] %v714_v10  ;;  %3634 = vst [vmem:[%s4606_s7 + $0x18] sm:$0xff] %v2382_v30  ;;  %v4788_v21 = vmul.f32 %v4290_v17, %v239_v29  ;;  %v879_v47 = vadd.s32 536870912, %v878_v62  ;;  %v4790_v46 = vand.u32 3, %v495_v1  ;;  %v4792_v28 = vand.u32 3, %v2164_v49 }
 0x116   : > { %v489_v32 = vmul.f32 %v488_v34, %v486_v44  ;;  %v730_v38 = vsub.s32 32, %v729_v33  ;;  %v722_v37 = vand.u32 8388607, %v715_v27  ;;  %v4796_v55 = vshrl.u32 %v727_v41, 5 }
 0x117   : > { %v880_v51 = vshrl.u32 %v879_v47, 30  ;;  %v1027_v59 = vand.u32 2139095040, %v4788_v21  ;;  %v732_v52 = vshll.u32 %v4205_v50, %v729_v33  ;;  %v735_v4 = vshll.u32 %v4206_v54, %v729_v33 }
 0x118   : > { %v490_v39 = vxor.u32 2147483648, %v489_v32  ;;  %v733_v40 = vshrl.u32 %v4206_v54, %v730_v38  ;;  %v736_v18 = vshrl.u32 %v4207_v56, %v730_v38  ;;  %v739_v17 = vshrl.u32 %v4208_v58, %v730_v38 }
 0x119   : > { %v742_v22 = vshrl.u32 %v4209_v60, %v730_v38  ;;  %v881_v36 = vshll.u32 %v880_v51, 30  ;;  %v745_v48 = vshrl.u32 %v4210_v3, %v730_v38  ;;  %v738_v63 = vshll.u32 %v4207_v56, %v729_v33 }
 0x11a   : > { %v491_v24 = vsel %vm408_vm1, %v490_v39, %v489_v32  ;;  %v741_v8 = vshll.u32 %v4208_v58, %v729_v33  ;;  %v734_v0 = vor.u32 %v733_v40, %v732_v52  ;;  %v744_v2 = vshll.u32 %v4209_v60, %v729_v33 }
 0x11b   : > { %v494_v1 = vsel %vm4709_vm0, %v4379_v16, %v491_v24  ;;  %v4813_v11 = vsub.s32 %v878_v62, %v881_v36  ;;  %v737_v12 = vor.u32 %v736_v18, %v735_v4  ;;  %v740_v61 = vor.u32 %v739_v17, %v738_v63 }
 0x11c   : > { %4054 = vcosq.f32 %v494_v1  ;;  %v743_v35 = vor.u32 %v742_v22, %v741_v8  ;;  %v746_v42 = vor.u32 %v745_v48, %v744_v2  ;;  %vm820_vm1 = vcmp.lt.s32.totalorder %v4501_v31, 0 }
 0x11d   : > { %4056 = vsinq.f32 %v494_v1  ;;  %v884_v13 = vsub.s32 0, %v4813_v11  ;;  %v904_v14 = vsub.s32 4, %v880_v51  ;;  %v723_v57 = vor.u32 8388608, %v722_v37 }
 0x11e   : > { %v731_v15 = vshrl.u32 %v4205_v50, %v730_v38  ;;  %vm504_vm0 = vcmp.eq.s32.totalorder %v4790_v46, 2  ;;  %vm2170_vm2 = vcmp.eq.s32.totalorder %v4792_v28, 2  ;;  %vm747_vm3 = vcmp.lt.s32.totalorder %v4796_v55, 1 }
 0x11f   : > { %v3806_v19 = vmin.u32 %v884_v13, %v4813_v11  ;;  %vm749_vm4 = vcmp.lt.s32.totalorder %v4796_v55, 3  ;;  %vm750_vm5 = vcmp.lt.s32.totalorder %v4796_v55, 4  ;;  %vm501_vm6 = vcmp.eq.s32.totalorder %v4790_v46, 0 }
 0x120   : > { %vm2167_vm7 = vcmp.eq.s32.totalorder %v4792_v28, 0  ;;  %v752_v9 = vsel %vm750_vm5, %v740_v61, 2102212464  ;;  %v755_v6 = vsel %vm747_vm3, %v734_v0, %v737_v12  ;;  %v756_v49 = vsel %vm750_vm5, %v743_v35, 920167782 }
 0x121   : > { %v1028_v23 = vshrl.u32 %v1027_v59, 23  ;;  %vm500_vm8 = vcmp.lt.s32.totalorder %v4790_v46, 2  ;;  %vm2166_vm9 = vcmp.lt.s32.totalorder %v4792_v28, 2  ;;  %v886_v53 = vclz %v3806_v19 }
 0x122   : > { %v757_v25 = vsel %vm749_vm4, %v740_v61, %v756_v49  ;;  %v759_v26 = vsel %vm747_vm3, %v737_v12, %v740_v61  ;;  %v760_v29 = vsel %vm750_vm5, %v746_v42, 1326507024  ;;  %vm498_vm10 = vweird.f32 %v4379_v16 }
 0x123   : > { %v874_v10 = vadd.s32 %v4746_v7, %v4758_v5  ;;  %vm748_vm11 = vcmp.lt.s32.totalorder %v4796_v55, 2  ;;  %v751_v30 = vsel %vm747_vm3, %v731_v15, %v734_v0  ;;  %v763_v43 = vshll.u32 %v723_v57, 8 }
 0x124   : > { %v3807_v41 = vadd.s32 4294967294, %v886_v53  ;;  %v753_v44 = vsel %vm749_vm4, %v737_v12, %v752_v9  ;;  %v758_v34 = vsel %vm748_vm11, %v755_v6, %v757_v25  ;;  %v761_v62 = vsel %vm749_vm4, %v743_v35, %v760_v29  ;;  %v234_v6 = vpop.permute.xlu0 %233 }
 0x125   : > { %v762_v33 = vsel %vm748_vm11, %v759_v26, %v761_v62  ;;  %v4849_v7 = vmul.u32.u64.low %v763_v43, %v758_v34  ;;  %v4850_v5 = vmul.u32.u64.high %v763_v43, %v758_v34, %v4849_v7  ;;  %v3813_v32 = vadd.s32 4294967169, %v1028_v23 }
 0x126   : > { %v4055_v47 = vpop.eup %4054  ;;  %vm3808_vm12 = vcmp.lt.s32.totalorder %v3807_v41, 0  ;;  %v905_v38 = vsel %vm820_vm1, %v904_v14, %v880_v51  ;;  %v4855_v37 = vmul.u32.u64.low %v763_v43, %v762_v33  ;;  %v4856_v39 = vmul.u32.u64.high %v763_v43, %v762_v33, %v4855_v37 }
 0x127   : > { %v4057_v40 = vpop.eup %4056  ;;  %v505_v18 = vxor.u32 2147483648, %v4055_v47  ;;  %v889_v17 = vsel %vm3808_vm12, 0, %v3807_v41  ;;  %v754_v22 = vsel %vm748_vm11, %v751_v30, %v753_v44  ;;  %v1034_v59 = vadd.s32 1, %v3813_v32  ;;  %v4900_v30 = vld [vmem:[%s5967_s1] ss:$0 sm:$0xff] }
 0x128   : > { %v502_v24 = vxor.u32 2147483648, %v4057_v40  ;;  %v890_v36 = vsub.s32 32, %v889_v17  ;;  %v891_v52 = vshll.u32 %v4813_v11, %v889_v17  ;;  %v894_v48 = vsub.s32 4294967266, %v889_v17 }
 0x129   : > { %v506_v1 = vsel %vm504_vm0, %v505_v18, %v4057_v40  ;;  %v2172_v51 = vsel %vm2170_vm2, %v505_v18, %v4057_v40  ;;  %v773_v4 = vadd.s32 1, %v4850_v5  ;;  %vm1035_vm13 = vcmp.gt.s32.totalorder %v1034_v59, 0 }
 0x12a   : > { %v503_v55 = vsel %vm501_vm6, %v4055_v47, %v502_v24  ;;  %v2169_v63 = vsel %vm2167_vm7, %v4055_v47, %v502_v24  ;;  %v892_v8 = vshrl.u32 %v874_v10, %v890_v36  ;;  %v895_v11 = vadd.s32 127, %v894_v48 }
 0x12b   : > { %v507_v0 = vsel %vm500_vm8, %v503_v55, %v506_v1  ;;  %v2173_v2 = vsel %vm2166_vm9, %v2169_v63, %v2172_v51  ;;  %v770_v12 = vmul.u32 %v763_v43, %v754_v22  ;;  %vm772_vm14 = vc.u32 %v4856_v39, %v4849_v7 }
 0x12c   : > { %v508_v61 = vsel %vm498_vm10, nan, %v507_v0  ;;  %v2174_v35 = vsel %vm498_vm10, nan, %v2173_v2  ;;  %v893_v13 = vor.u32 %v892_v8, %v891_v52  ;;  %v896_v42 = vshll.u32 %v895_v11, 23 }
 0x12d   : > { %1952 = vst [vmem:[%s4601_s6 + $0x8] sm:$0xff] %v508_v61  ;;  %3632 = vst [vmem:[%s4606_s7 + $0x8] sm:$0xff] %v2174_v35  ;;  %v774_v46 = vsel %vm772_vm14, %v773_v4, %v4850_v5  ;;  %v1024_v14 = vand.u32 2147483647, %v4788_v21  ;;  %v1036_v28 = vsel %vm1035_vm13, %v1034_v59, 0  ;;  %v4903_v43 = vmul.f32 %v4900_v30, %v234_v6 }
 0x12e   : > { %vm4887_vm15 = vcmp.le.f32.partialorder %v818_v45, 0.7853982  ;;  %v897_v15 = vor.u32 4788187, %v896_v42  ;;  %v775_v19 = vadd.s32 %v774_v46, %v770_v12  ;;  %v1038_v9 = vand.u32 31, %v1036_v28 }
 0x12f   : > { %v907_v16 = vsel %vm4887_vm15, 0, %v905_v38  ;;  %v900_v23 = vcvt.s32.f32 %v893_v13  ;;  %v1031_v25 = vand.u32 8388607, %v1024_v14  ;;  %v1037_v41 = vshrl.u32 %v1036_v28, 5 }
 0x130   : > { %v898_v49 = vand.u32 2147483647, %v897_v15  ;;  %v776_v53 = vadd.s32 536870912, %v775_v19  ;;  %v1039_v26 = vsub.s32 32, %v1038_v9  ;;  %v2580_v10 = vadd.s32 3, %v907_v16 }
 0x131   : > { %v1041_v32 = vshll.u32 %v4205_v50, %v1038_v9  ;;  %v1044_v38 = vshll.u32 %v4206_v54, %v1038_v9  ;;  %v1047_v37 = vshll.u32 %v4207_v56, %v1038_v9  ;;  %v1050_v40 = vshll.u32 %v4208_v58, %v1038_v9 }
 0x132   : > { %v901_v29 = vmul.f32 %v900_v23, %v898_v49  ;;  %v4895_v45 = vshrl.u32 %v776_v53, 30  ;;  %v1042_v44 = vshrl.u32 %v4206_v54, %v1039_v26  ;;  %v1045_v34 = vshrl.u32 %v4207_v56, %v1039_v26 }
 0x133   : > { %v1048_v62 = vshrl.u32 %v4208_v58, %v1039_v26  ;;  %v1051_v47 = vshrl.u32 %v4209_v60, %v1039_v26  ;;  %v1054_v18 = vshrl.u32 %v4210_v3, %v1039_v26  ;;  %v1053_v24 = vshll.u32 %v4209_v60, %v1038_v9 }
 0x134   : > { %v902_v33 = vxor.u32 2147483648, %v901_v29  ;;  %v778_v5 = vshll.u32 %v4895_v45, 30  ;;  %v1043_v59 = vor.u32 %v1042_v44, %v1041_v32  ;;  %v1046_v52 = vor.u32 %v1045_v34, %v1044_v38 }
 0x135   : > { %v1049_v48 = vor.u32 %v1048_v62, %v1047_v37  ;;  %v1052_v1 = vor.u32 %v1051_v47, %v1050_v40  ;;  %v4923_v51 = vand.u32 3, %v907_v16  ;;  %v1055_v55 = vor.u32 %v1054_v18, %v1053_v24 }
 0x136   : > { %v903_v17 = vsel %vm820_vm1, %v902_v33, %v901_v29  ;;  %v4917_v22 = vsub.s32 %v775_v19, %v778_v5  ;;  %v4926_v63 = vand.u32 3, %v2580_v10  ;;  %vm717_vm1 = vcmp.lt.s32.totalorder %v4679_v20, 0 }
 0x137   : > { %v906_v36 = vsel %vm4887_vm15, %v4501_v31, %v903_v17  ;;  %v1032_v8 = vor.u32 8388608, %v1031_v25  ;;  %v924_v11 = vand.u32 2139095040, %v4903_v43  ;;  %v1040_v2 = vshrl.u32 %v4205_v50, %v1039_v26 }
 0x138   : > { %4058 = vcosq.f32 %v906_v36  ;;  %v781_v4 = vsub.s32 0, %v4917_v22  ;;  %vm1056_vm0 = vcmp.lt.s32.totalorder %v1037_v41, 1  ;;  %vm1059_vm2 = vcmp.lt.s32.totalorder %v1037_v41, 4 }
 0x139   : > { %4060 = vsinq.f32 %v906_v36  ;;  %vm1058_vm3 = vcmp.lt.s32.totalorder %v1037_v41, 3  ;;  %v1061_v12 = vsel %vm1059_vm2, %v1049_v48, 2102212464  ;;  %v1064_v61 = vsel %vm1056_vm0, %v1043_v59, %v1046_v52 }
 0x13a   : > { %v3802_v0 = vmin.u32 %v781_v4, %v4917_v22  ;;  %v1065_v35 = vsel %vm1059_vm2, %v1052_v1, 920167782  ;;  %vm916_vm4 = vcmp.eq.s32.totalorder %v4923_v51, 2  ;;  %v1068_v46 = vsel %vm1056_vm0, %v1046_v52, %v1049_v48  ;;  %v249_v4 = vpop.permute.xlu1 %248 }
 0x13b   : > { %v1066_v42 = vsel %vm1058_vm3, %v1049_v48, %v1065_v35  ;;  %v1069_v28 = vsel %vm1059_vm2, %v1055_v55, 1326507024  ;;  %vm913_vm5 = vcmp.eq.s32.totalorder %v4923_v51, 0  ;;  %vm1057_vm6 = vcmp.lt.s32.totalorder %v1037_v41, 2 }
 0x13c   : > { %v783_v13 = vclz %v3802_v0  ;;  %v1060_v57 = vsel %vm1056_vm0, %v1040_v2, %v1043_v59  ;;  %v1062_v15 = vsel %vm1058_vm3, %v1046_v52, %v1061_v12  ;;  %v1072_v19 = vshll.u32 %v1032_v8, 8 }
 0x13d   : > { %vm912_vm7 = vcmp.lt.s32.totalorder %v4923_v51, 2  ;;  %vm2582_vm8 = vcmp.lt.s32.totalorder %v4926_v63, 2  ;;  %v801_v9 = vsub.s32 4, %v4895_v45  ;;  %v1067_v6 = vsel %vm1057_vm6, %v1064_v61, %v1066_v42 }
 0x13e   : > { %v3803_v16 = vadd.s32 4294967294, %v783_v13  ;;  %v1070_v49 = vsel %vm1058_vm3, %v1052_v1, %v1069_v28  ;;  %vm910_vm9 = vweird.f32 %v4501_v31  ;;  %v925_v26 = vshrl.u32 %v924_v11, 23 }
 0x13f   : > { %v1071_v23 = vsel %vm1057_vm6, %v1068_v46, %v1070_v49  ;;  %v4943_v53 = vmul.u32.u64.low %v1072_v19, %v1067_v6  ;;  %v4944_v25 = vmul.u32.u64.high %v1072_v19, %v1067_v6, %v4943_v53  ;;  %vm4949_vm10 = vcmp.le.f32.partialorder %v715_v27, 0.7853982 }
 0x140   : > { %vm3804_vm11 = vcmp.lt.s32.totalorder %v3803_v16, 0  ;;  %v1063_v10 = vsel %vm1057_vm6, %v1060_v57, %v1062_v15  ;;  %v4954_v44 = vmul.u32.u64.low %v1072_v19, %v1071_v23  ;;  %v4955_v34 = vmul.u32.u64.high %v1072_v19, %v1071_v23, %v4954_v44 }
 0x141   : > { %vm2583_vm12 = vcmp.eq.s32.totalorder %v4926_v63, 0  ;;  %vm2586_vm13 = vcmp.eq.s32.totalorder %v4926_v63, 2  ;;  %v786_v62 = vsel %vm3804_vm11, 0, %v3803_v16  ;;  %v3809_v33 = vadd.s32 4294967169, %v925_v26 }
 0x142   : > { %v4059_v5 = vpop.eup %4058  ;;  %v771_v32 = vadd.s32 %v4849_v7, %v4856_v39  ;;  %v787_v27 = vsub.s32 32, %v786_v62  ;;  %v791_v47 = vsub.s32 4294967266, %v786_v62  ;;  %v802_v41 = vsel %vm717_vm1, %v801_v9, %v4895_v45 }
 0x143   : > { %v4061_v38 = vpop.eup %4060  ;;  %v917_v37 = vxor.u32 2147483648, %v4059_v5  ;;  %v1079_v40 = vmul.u32 %v1072_v19, %v1063_v10  ;;  %v1082_v18 = vadd.s32 1, %v4944_v25  ;;  %v931_v17 = vadd.s32 1, %v3809_v33 }
 0x144   : > { %v914_v59 = vxor.u32 2147483648, %v4061_v38  ;;  %v788_v24 = vshll.u32 %v4917_v22, %v786_v62  ;;  %v789_v36 = vshrl.u32 %v771_v32, %v787_v27  ;;  %v792_v52 = vadd.s32 127, %v791_v47 }
 0x145   : > { %v918_v7 = vsel %vm916_vm4, %v917_v37, %v4061_v38  ;;  %v2588_v39 = vsel %vm2586_vm13, %v917_v37, %v4061_v38  ;;  %vm1081_vm14 = vc.u32 %v4955_v34, %v4943_v53  ;;  %vm932_vm15 = vcmp.gt.s32.totalorder %v931_v17, 0 }
 0x146   : > { %v915_v45 = vsel %vm913_vm5, %v4059_v5, %v914_v59  ;;  %v2585_v22 = vsel %vm2583_vm12, %v4059_v5, %v914_v59  ;;  %v790_v48 = vor.u32 %v789_v36, %v788_v24  ;;  %v793_v1 = vshll.u32 %v792_v52, 23 }
 0x147   : > { %v919_v55 = vsel %vm912_vm7, %v915_v45, %v918_v7  ;;  %v2589_v8 = vsel %vm2582_vm8, %v2585_v22, %v2588_v39  ;;  %v1083_v11 = vsel %vm1081_vm14, %v1082_v18, %v4944_v25  ;;  %v933_v0 = vsel %vm932_vm15, %v931_v17, 0 }
 0x148   : > { %v920_v2 = vsel %vm910_vm9, nan, %v919_v55  ;;  %v2590_v12 = vsel %vm910_vm9, nan, %v2589_v8  ;;  %v794_v61 = vor.u32 4788187, %v793_v1  ;;  %v921_v35 = vand.u32 2147483647, %v4903_v43 }
 0x149   : > { %1956 = vst [vmem:[%s4601_s6 + $0x28] sm:$0xff] %v920_v2  ;;  %3636 = vst [vmem:[%s4606_s7 + $0x28] sm:$0xff] %v2590_v12  ;;  %v804_v51 = vsel %vm4949_vm10, 0, %v802_v41  ;;  %v1084_v13 = vadd.s32 %v1083_v11, %v1079_v40  ;;  %v935_v63 = vand.u32 31, %v933_v0  ;;  %v4991_v42 = vmul.f32 %v4900_v30, %v249_v4 }
 0x14a   : > { %v795_v46 = vand.u32 2147483647, %v794_v61  ;;  %v797_v28 = vcvt.s32.f32 %v790_v48  ;;  %vm1026_vm0 = vcmp.lt.s32.totalorder %v4788_v21, 0  ;;  %v4994_v19 = vand.u32 3, %v804_v51 }
 0x14b   : > { %v1085_v57 = vadd.s32 536870912, %v1084_v13  ;;  %v936_v31 = vsub.s32 32, %v935_v63  ;;  %v2476_v16 = vadd.s32 3, %v804_v51  ;;  %v928_v9 = vand.u32 8388607, %v921_v35 }
 0x14c   : > { %v798_v15 = vmul.f32 %v797_v28, %v795_v46  ;;  %v4998_v49 = vshrl.u32 %v933_v0, 5  ;;  %v1233_v25 = vand.u32 2139095040, %v4991_v42  ;;  %v938_v5 = vshll.u32 %v4205_v50, %v935_v63 }
 0x14d   : > { %v1086_v6 = vshrl.u32 %v1085_v57, 30  ;;  %v939_v23 = vshrl.u32 %v4206_v54, %v936_v31  ;;  %v942_v10 = vshrl.u32 %v4207_v56, %v936_v31  ;;  %v945_v44 = vshrl.u32 %v4208_v58, %v936_v31 }
 0x14e   : > { %v799_v26 = vxor.u32 2147483648, %v798_v15  ;;  %v948_v62 = vshrl.u32 %v4209_v60, %v936_v31  ;;  %v941_v32 = vshll.u32 %v4206_v54, %v935_v63  ;;  %v951_v27 = vshrl.u32 %v4210_v3, %v936_v31 }
 0x14f   : > { %v1087_v33 = vshll.u32 %v1086_v6, 30  ;;  %v1110_v41 = vsub.s32 4, %v1086_v6  ;;  %v944_v38 = vshll.u32 %v4207_v56, %v935_v63  ;;  %v947_v37 = vshll.u32 %v4208_v58, %v935_v63 }
 0x150   : > { %v800_v47 = vsel %vm717_vm1, %v799_v26, %v798_v15  ;;  %v940_v17 = vor.u32 %v939_v23, %v938_v5  ;;  %v950_v59 = vshll.u32 %v4209_v60, %v935_v63  ;;  %v943_v24 = vor.u32 %v942_v10, %v941_v32 }
 0x151   : > { %v803_v40 = vsel %vm4949_vm10, %v4679_v20, %v800_v47  ;;  %v5015_v18 = vsub.s32 %v1084_v13, %v1087_v33  ;;  %v946_v36 = vor.u32 %v945_v44, %v944_v38  ;;  %v949_v52 = vor.u32 %v948_v62, %v947_v37 }
 0x152   : > { %4062 = vcosq.f32 %v803_v40  ;;  %v5018_v7 = vand.u32 3, %v2476_v16  ;;  %v952_v45 = vor.u32 %v951_v27, %v950_v59  ;;  %vm5023_vm1 = vcmp.le.f32.partialorder %v1024_v14, 0.7853982 }
 0x153   : > { %4064 = vsinq.f32 %v803_v40  ;;  %v1090_v39 = vsub.s32 0, %v5015_v18  ;;  %v1111_v22 = vsel %vm1026_vm0, %v1110_v41, %v1086_v6  ;;  %v929_v48 = vor.u32 8388608, %v928_v9 }
 0x154   : > { %v937_v1 = vshrl.u32 %v4205_v50, %v936_v31  ;;  %vm953_vm2 = vcmp.lt.s32.totalorder %v4998_v49, 1  ;;  %vm955_vm3 = vcmp.lt.s32.totalorder %v4998_v49, 3  ;;  %vm956_vm4 = vcmp.lt.s32.totalorder %v4998_v49, 4 }
 0x155   : > { %v3814_v4 = vmin.u32 %v1090_v39, %v5015_v18  ;;  %vm813_vm5 = vcmp.eq.s32.totalorder %v4994_v19, 2  ;;  %v958_v14 = vsel %vm956_vm4, %v946_v36, 2102212464  ;;  %v961_v55 = vsel %vm953_vm2, %v940_v17, %v943_v24 }
 0x156   : > { %v962_v8 = vsel %vm956_vm4, %v949_v52, 920167782  ;;  %v1234_v11 = vshrl.u32 %v1233_v25, 23  ;;  %vm810_vm6 = vcmp.eq.s32.totalorder %v4994_v19, 0  ;;  %vm2479_vm7 = vcmp.eq.s32.totalorder %v5018_v7, 0 }
 0x157   : > { %v1092_v0 = vclz %v3814_v4  ;;  %v963_v2 = vsel %vm955_vm3, %v946_v36, %v962_v8  ;;  %v965_v12 = vsel %vm953_vm2, %v943_v24, %v946_v36  ;;  %v966_v61 = vsel %vm956_vm4, %v952_v45, 1326507024  ;;  %v244_v8 = vpop.permute.xlu0 %243 }
 0x158   : > { %vm809_vm8 = vcmp.lt.s32.totalorder %v4994_v19, 2  ;;  %vm2478_vm9 = vcmp.lt.s32.totalorder %v5018_v7, 2  ;;  %v1113_v51 = vsel %vm5023_vm1, 0, %v1111_v22  ;;  %vm954_vm10 = vcmp.lt.s32.totalorder %v4998_v49, 2 }
 0x159   : > { %v957_v13 = vsel %vm953_vm2, %v937_v1, %v940_v17  ;;  %v969_v63 = vshll.u32 %v929_v48, 8  ;;  %vm807_vm11 = vweird.f32 %v4679_v20  ;;  %v3815_v46 = vadd.s32 4294967294, %v1092_v0 }
 0x15a   : > { %v959_v28 = vsel %vm955_vm3, %v943_v24, %v958_v14  ;;  %v964_v57 = vsel %vm954_vm10, %v961_v55, %v963_v2  ;;  %v967_v31 = vsel %vm955_vm3, %v949_v52, %v966_v61  ;;  %v3821_v6 = vadd.s32 4294967169, %v1234_v11 }
 0x15b   : > { %v968_v15 = vsel %vm954_vm10, %v965_v12, %v967_v31  ;;  %v5059_v16 = vmul.u32.u64.low %v969_v63, %v964_v57  ;;  %v5060_v9 = vmul.u32.u64.high %v969_v63, %v964_v57, %v5059_v16  ;;  %vm2482_vm12 = vcmp.eq.s32.totalorder %v5018_v7, 2 }
 0x15c   : > { %vm3816_vm13 = vcmp.lt.s32.totalorder %v3815_v46, 0  ;;  %v5064_v23 = vmul.u32.u64.low %v969_v63, %v968_v15  ;;  %v5065_v25 = vmul.u32.u64.high %v969_v63, %v968_v15, %v5064_v23  ;;  %v4063_v26 = vpop.eup %4062  ;;  %v1080_v10 = vadd.s32 %v4943_v53, %v4955_v34 }
 0x15d   : > { %v1095_v44 = vsel %vm3816_vm13, 0, %v3815_v46  ;;  %v2788_v62 = vadd.s32 3, %v1113_v51  ;;  %v1240_v33 = vadd.s32 1, %v3821_v6  ;;  %v4065_v5 = vpop.eup %4064  ;;  %v814_v32 = vxor.u32 2147483648, %v4063_v26 }
 0x15e   : > { %v1096_v27 = vsub.s32 32, %v1095_v44  ;;  %v1100_v47 = vsub.s32 4294967266, %v1095_v44  ;;  %v960_v41 = vsel %vm954_vm10, %v957_v13, %v959_v28  ;;  %v811_v38 = vxor.u32 2147483648, %v4065_v5 }
 0x15f   : > { %v1097_v37 = vshll.u32 %v5015_v18, %v1095_v44  ;;  %v979_v40 = vadd.s32 1, %v5060_v9  ;;  %vm1241_vm14 = vcmp.gt.s32.totalorder %v1240_v33, 0  ;;  %v815_v17 = vsel %vm813_vm5, %v814_v32, %v4065_v5 }
 0x160   : > { %v2484_v53 = vsel %vm2482_vm12, %v814_v32, %v4065_v5  ;;  %v1098_v34 = vshrl.u32 %v1080_v10, %v1096_v27  ;;  %v1101_v59 = vadd.s32 127, %v1100_v47  ;;  %v812_v49 = vsel %vm810_vm6, %v4063_v26, %v811_v38 }
 0x161   : > { %v2481_v24 = vsel %vm2479_vm7, %v4063_v26, %v811_v38  ;;  %v976_v18 = vmul.u32 %v969_v63, %v960_v41  ;;  %vm978_vm15 = vc.u32 %v5065_v25, %v5059_v16  ;;  %v816_v36 = vsel %vm809_vm8, %v812_v49, %v815_v17 }
 0x162   : > { %v2485_v52 = vsel %vm2478_vm9, %v2481_v24, %v2484_v53  ;;  %v1099_v39 = vor.u32 %v1098_v34, %v1097_v37  ;;  %v1102_v45 = vshll.u32 %v1101_v59, 23  ;;  %v817_v22 = vsel %vm807_vm11, nan, %v816_v36 }
 0x163   : > { %v2486_v48 = vsel %vm807_vm11, nan, %v2485_v52  ;;  %v980_v1 = vsel %vm978_vm15, %v979_v40, %v5060_v9  ;;  %v1242_v4 = vsel %vm1241_vm14, %v1240_v33, 0  ;;  %1955 = vst [vmem:[%s4601_s6 + $0x20] sm:$0xff] %v817_v22  ;;  %v1230_v55 = vand.u32 2147483647, %v4991_v42 }
 0x164   : > { %3635 = vst [vmem:[%s4606_s7 + $0x20] sm:$0xff] %v2486_v48  ;;  %v1103_v14 = vor.u32 4788187, %v1102_v45  ;;  %v981_v19 = vadd.s32 %v980_v1, %v976_v18  ;;  %v1244_v7 = vand.u32 31, %v1242_v4  ;;  %v1106_v0 = vcvt.s32.f32 %v1099_v39 }
 0x165   : > { %v5096_v12 = vand.u32 3, %v1113_v51  ;;  %v5098_v61 = vand.u32 3, %v2788_v62  ;;  %v1237_v46 = vand.u32 8388607, %v1230_v55  ;;  %v5103_v28 = vmul.f32 %v4900_v30, %v244_v8 }
 0x166   : > { %v1104_v11 = vand.u32 2147483647, %v1103_v14  ;;  %v982_v2 = vadd.s32 536870912, %v981_v19  ;;  %v1245_v20 = vsub.s32 32, %v1244_v7  ;;  %v1243_v57 = vshrl.u32 %v1242_v4, 5 }
 0x167   : > { %v1247_v23 = vshll.u32 %v4205_v50, %v1244_v7  ;;  %vm923_vm2 = vcmp.lt.s32.totalorder %v4903_v43, 0  ;;  %v1250_v10 = vshll.u32 %v4206_v54, %v1244_v7  ;;  %v1253_v44 = vshll.u32 %v4207_v56, %v1244_v7 }
 0x168   : > { %v1107_v13 = vmul.f32 %v1106_v0, %v1104_v11  ;;  %v983_v63 = vshrl.u32 %v982_v2, 30  ;;  %v1248_v31 = vshrl.u32 %v4206_v54, %v1245_v20  ;;  %v1251_v15 = vshrl.u32 %v4207_v56, %v1245_v20 }
 0x169   : > { %v1254_v9 = vshrl.u32 %v4208_v58, %v1245_v20  ;;  %v1257_v26 = vshrl.u32 %v4209_v60, %v1245_v20  ;;  %v1256_v62 = vshll.u32 %v4208_v58, %v1244_v7  ;;  %v1260_v33 = vshrl.u32 %v4210_v3, %v1245_v20 }
 0x16a   : > { %v1108_v51 = vxor.u32 2147483648, %v1107_v13  ;;  %v984_v6 = vshll.u32 %v983_v63, 30  ;;  %v1249_v27 = vor.u32 %v1248_v31, %v1247_v23  ;;  %v1259_v47 = vshll.u32 %v4209_v60, %v1244_v7 }
 0x16b   : > { %v1252_v38 = vor.u32 %v1251_v15, %v1250_v10  ;;  %v1255_v37 = vor.u32 %v1254_v9, %v1253_v44  ;;  %v1258_v40 = vor.u32 %v1257_v26, %v1256_v62  ;;  %v1246_v53 = vshrl.u32 %v4205_v50, %v1245_v20 }
 0x16c   : > { %v1109_v5 = vsel %vm1026_vm0, %v1108_v51, %v1107_v13  ;;  %v5117_v32 = vsub.s32 %v981_v19, %v984_v6  ;;  %v1261_v34 = vor.u32 %v1260_v33, %v1259_v47  ;;  %v1007_v59 = vsub.s32 4, %v983_v63 }
 0x16d   : > { %v1112_v41 = vsel %vm5023_vm1, %v4788_v21, %v1109_v5  ;;  %v1238_v49 = vor.u32 8388608, %v1237_v46  ;;  %vm1262_vm0 = vcmp.lt.s32.totalorder %v1243_v57, 1  ;;  %vm5127_vm3 = vcmp.le.f32.partialorder %v921_v35, 0.7853982 }
 0x16e   : > { %4066 = vcosq.f32 %v1112_v41  ;;  %v987_v17 = vsub.s32 0, %v5117_v32  ;;  %vm1264_vm1 = vcmp.lt.s32.totalorder %v1243_v57, 3  ;;  %vm1265_vm4 = vcmp.lt.s32.totalorder %v1243_v57, 4 }
 0x16f   : > { %4068 = vsinq.f32 %v1112_v41  ;;  %v1266_v18 = vsel %vm1262_vm0, %v1246_v53, %v1249_v27  ;;  %v1267_v36 = vsel %vm1265_vm4, %v1255_v37, 2102212464  ;;  %v1270_v52 = vsel %vm1262_vm0, %v1249_v27, %v1252_v38 }
 0x170   : > { %v3810_v29 = vmin.u32 %v987_v17, %v5117_v32  ;;  %v1271_v39 = vsel %vm1265_vm4, %v1258_v40, 920167782  ;;  %v1274_v45 = vsel %vm1262_vm0, %v1252_v38, %v1255_v37  ;;  %v1268_v48 = vsel %vm1264_vm1, %v1252_v38, %v1267_v36 }
 0x171   : > { %v1272_v1 = vsel %vm1264_vm1, %v1255_v37, %v1271_v39  ;;  %v1275_v4 = vsel %vm1265_vm4, %v1261_v34, 1326507024  ;;  %vm1119_vm5 = vcmp.eq.s32.totalorder %v5096_v12, 0  ;;  %vm1122_vm6 = vcmp.eq.s32.totalorder %v5096_v12, 2 }
 0x172   : > { %v989_v22 = vclz %v3810_v29  ;;  %vm1263_vm7 = vcmp.lt.s32.totalorder %v1243_v57, 2  ;;  %v1278_v35 = vshll.u32 %v1238_v49, 8  ;;  %vm1118_vm8 = vcmp.lt.s32.totalorder %v5096_v12, 2 }
 0x173   : > { %vm2790_vm9 = vcmp.lt.s32.totalorder %v5098_v61, 2  ;;  %v1008_v19 = vsel %vm923_vm2, %v1007_v59, %v983_v63  ;;  %v1273_v7 = vsel %vm1263_vm7, %v1270_v52, %v1272_v1  ;;  %v1276_v8 = vsel %vm1264_vm1, %v1258_v40, %v1275_v4  ;;  %v259_v52 = vpop.permute.xlu1 %258 }
 0x174   : > { %v3811_v14 = vadd.s32 4294967294, %v989_v22  ;;  %vm1116_vm10 = vweird.f32 %v4788_v21  ;;  %v1269_v11 = vsel %vm1263_vm7, %v1266_v18, %v1268_v48  ;;  %v1277_v0 = vsel %vm1263_vm7, %v1274_v45, %v1276_v8 }
 0x175   : > { %v5142_v2 = vmul.u32.u64.low %v1278_v35, %v1273_v7  ;;  %v5143_v20 = vmul.u32.u64.high %v1278_v35, %v1273_v7, %v5142_v2  ;;  %v5146_v13 = vmul.u32.u64.low %v1278_v35, %v1277_v0  ;;  %v5147_v46 = vmul.u32.u64.high %v1278_v35, %v1277_v0, %v5146_v13 }
 0x176   : > { %vm3812_vm11 = vcmp.lt.s32.totalorder %v3811_v14, 0  ;;  %v1130_v31 = vand.u32 2139095040, %v5103_v28  ;;  %vm2791_vm12 = vcmp.eq.s32.totalorder %v5098_v61, 0  ;;  %vm2794_vm13 = vcmp.eq.s32.totalorder %v5098_v61, 2 }
 0x177   : > { %v977_v63 = vadd.s32 %v5059_v16, %v5065_v25  ;;  %v992_v57 = vsel %vm3812_vm11, 0, %v3811_v14  ;;  %v1127_v6 = vand.u32 2147483647, %v5103_v28  ;;  %v1010_v44 = vsel %vm5127_vm3, 0, %v1008_v19 }
 0x178   : > { %v4067_v15 = vpop.eup %4066  ;;  %v993_v9 = vsub.s32 32, %v992_v57  ;;  %v997_v51 = vsub.s32 4294967266, %v992_v57  ;;  %v1131_v23 = vshrl.u32 %v1130_v31, 23  ;;  %v1285_v62 = vmul.u32 %v1278_v35, %v1269_v11 }
 0x179   : > { %v4069_v26 = vpop.eup %4068  ;;  %v1123_v10 = vxor.u32 2147483648, %v4067_v15  ;;  %v1288_v33 = vadd.s32 1, %v5143_v20  ;;  %v994_v27 = vshll.u32 %v5117_v32, %v992_v57  ;;  %vm1287_vm14 = vc.u32 %v5147_v46, %v5142_v2 }
 0x17a   : > { %v1120_v5 = vxor.u32 2147483648, %v4069_v26  ;;  %v995_v47 = vshrl.u32 %v977_v63, %v993_v9  ;;  %v998_v16 = vadd.s32 127, %v997_v51  ;;  %v3817_v38 = vadd.s32 4294967169, %v1131_v23 }
 0x17b   : > { %v1124_v25 = vsel %vm1122_vm6, %v1123_v10, %v4069_v26  ;;  %v2796_v41 = vsel %vm2794_vm13, %v1123_v10, %v4069_v26  ;;  %v1289_v59 = vsel %vm1287_vm14, %v1288_v33, %v5143_v20  ;;  %v2684_v22 = vadd.s32 3, %v1010_v44 }
 0x17c   : > { %v1121_v37 = vsel %vm1119_vm5, %v4067_v15, %v1120_v5  ;;  %v2793_v32 = vsel %vm2791_vm12, %v4067_v15, %v1120_v5  ;;  %v996_v40 = vor.u32 %v995_v47, %v994_v27  ;;  %v999_v17 = vshll.u32 %v998_v16, 23 }
 0x17d   : > { %v1125_v53 = vsel %vm1118_vm8, %v1121_v37, %v1124_v25  ;;  %v2797_v34 = vsel %vm2790_vm9, %v2793_v32, %v2796_v41  ;;  %v1137_v49 = vadd.s32 1, %v3817_v38  ;;  %v1290_v39 = vadd.s32 %v1289_v59, %v1285_v62 }
 0x17e   : > { %v1126_v29 = vsel %vm1116_vm10, nan, %v1125_v53  ;;  %v2798_v18 = vsel %vm1116_vm10, nan, %v2797_v34  ;;  %v1000_v36 = vor.u32 4788187, %v999_v17  ;;  %v1003_v45 = vcvt.s32.f32 %v996_v40 }
 0x17f   : > { %1958 = vst [vmem:[%s4601_s6 + $0x38] sm:$0xff] %v1126_v29  ;;  %3638 = vst [vmem:[%s4606_s7 + $0x38] sm:$0xff] %v2798_v18  ;;  %vm1138_vm15 = vcmp.gt.s32.totalorder %v1137_v49, 0  ;;  %v1291_v48 = vadd.s32 536870912, %v1290_v39  ;;  %v1134_v1 = vand.u32 8388607, %v1127_v6  ;;  %v5183_v35 = vmul.f32 %v4900_v30, %v259_v52 }
 0x180   : > { %v1001_v12 = vand.u32 2147483647, %v1000_v36  ;;  %v1139_v61 = vsel %vm1138_vm15, %v1137_v49, 0  ;;  %v5185_v8 = vand.u32 3, %v1010_v44  ;;  %v5187_v11 = vand.u32 3, %v2684_v22 }
 0x181   : > { %v1141_v4 = vand.u32 31, %v1139_v61  ;;  %v1292_v14 = vshrl.u32 %v1291_v48, 30  ;;  %vm1232_vm0 = vcmp.lt.s32.totalorder %v4991_v42, 0  ;;  %v1135_v20 = vor.u32 8388608, %v1134_v1 }
 0x182   : > { %v1004_v21 = vmul.f32 %v1003_v45, %v1001_v12  ;;  %v1140_v13 = vshrl.u32 %v1139_v61, 5  ;;  %v1439_v31 = vand.u32 2139095040, %v5183_v35  ;;  %vm5195_vm1 = vcmp.le.f32.partialorder %v1230_v55, 0.7853982 }
 0x183   : > { %v1142_v19 = vsub.s32 32, %v1141_v4  ;;  %v1293_v0 = vshll.u32 %v1292_v14, 30  ;;  %v1150_v10 = vshll.u32 %v4207_v56, %v1141_v4  ;;  %v1316_v55 = vsub.s32 4, %v1292_v14 }
 0x184   : > { %v1005_v7 = vxor.u32 2147483648, %v1004_v21  ;;  %v1144_v62 = vshll.u32 %v4205_v50, %v1141_v4  ;;  %v1147_v33 = vshll.u32 %v4206_v54, %v1141_v4  ;;  %v1153_v47 = vshll.u32 %v4208_v58, %v1141_v4 }
 0x185   : > { %v1145_v15 = vshrl.u32 %v4206_v54, %v1142_v19  ;;  %v1148_v9 = vshrl.u32 %v4207_v56, %v1142_v19  ;;  %v1151_v51 = vshrl.u32 %v4208_v58, %v1142_v19  ;;  %v5205_v26 = vsub.s32 %v1290_v39, %v1293_v0 }
 0x186   : > { %v1006_v63 = vsel %vm923_vm2, %v1005_v7, %v1004_v21  ;;  %v1154_v44 = vshrl.u32 %v4209_v60, %v1142_v19  ;;  %v1156_v25 = vshll.u32 %v4209_v60, %v1141_v4  ;;  %v1157_v41 = vshrl.u32 %v4210_v3, %v1142_v19 }
 0x187   : > { %v1009_v23 = vsel %vm5127_vm3, %v4903_v43, %v1006_v63  ;;  %v1296_v5 = vsub.s32 0, %v5205_v26  ;;  %v1152_v27 = vor.u32 %v1151_v51, %v1150_v10  ;;  %v1146_v24 = vor.u32 %v1145_v15, %v1144_v62 }
 0x188   : > { %4070 = vcosq.f32 %v1009_v23  ;;  %v1149_v16 = vor.u32 %v1148_v9, %v1147_v33  ;;  %v1286_v38 = vadd.s32 %v5142_v2, %v5147_v46  ;;  %v1155_v32 = vor.u32 %v1154_v44, %v1153_v47 }
 0x189   : > { %4072 = vsinq.f32 %v1009_v23  ;;  %v3822_v37 = vmin.u32 %v1296_v5, %v5205_v26  ;;  %v1440_v40 = vshrl.u32 %v1439_v31, 23  ;;  %vm1019_vm2 = vcmp.eq.s32.totalorder %v5185_v8, 2 }
 0x18a   : > { %vm2690_vm3 = vcmp.eq.s32.totalorder %v5187_v11, 2  ;;  %v1317_v17 = vsel %vm1232_vm0, %v1316_v55, %v1292_v14  ;;  %v1143_v53 = vshrl.u32 %v4205_v50, %v1142_v19  ;;  %v1158_v34 = vor.u32 %v1157_v41, %v1156_v25 }
 0x18b   : > { %vm1162_vm4 = vcmp.lt.s32.totalorder %v1140_v13, 4  ;;  %vm1016_vm5 = vcmp.eq.s32.totalorder %v5185_v8, 0  ;;  %vm2687_vm6 = vcmp.eq.s32.totalorder %v5187_v11, 0  ;;  %v1298_v2 = vclz %v3822_v37 }
 0x18c   : > { %vm1159_vm7 = vcmp.lt.s32.totalorder %v1140_v13, 1  ;;  %vm1161_vm8 = vcmp.lt.s32.totalorder %v1140_v13, 3  ;;  %v1164_v46 = vsel %vm1162_vm4, %v1152_v27, 2102212464  ;;  %vm1015_vm9 = vcmp.lt.s32.totalorder %v5185_v8, 2 }
 0x18d   : > { %vm2686_vm10 = vcmp.lt.s32.totalorder %v5187_v11, 2  ;;  %v1163_v59 = vsel %vm1159_vm7, %v1143_v53, %v1146_v24  ;;  %v1165_v49 = vsel %vm1161_vm8, %v1149_v16, %v1164_v46  ;;  %v1167_v29 = vsel %vm1159_vm7, %v1146_v24, %v1149_v16 }
 0x18e   : > { %v1175_v18 = vshll.u32 %v1135_v20, 8  ;;  %vm1013_vm11 = vweird.f32 %v4903_v43  ;;  %v3823_v36 = vadd.s32 4294967294, %v1298_v2  ;;  %v1319_v52 = vsel %vm5195_vm1, 0, %v1317_v17  ;;  %v254_v2 = vpop.permute.xlu0 %253 }
 0x18f   : > { %v1168_v39 = vsel %vm1162_vm4, %v1155_v32, 920167782  ;;  %v1171_v12 = vsel %vm1159_vm7, %v1149_v16, %v1152_v27  ;;  %vm1160_vm12 = vcmp.lt.s32.totalorder %v1140_v13, 2  ;;  %v1172_v22 = vsel %vm1162_vm4, %v1158_v34, 1326507024 }
 0x190   : > { %v1169_v45 = vsel %vm1161_vm8, %v1152_v27, %v1168_v39  ;;  %v3829_v61 = vadd.s32 4294967169, %v1440_v40  ;;  %vm3824_vm13 = vcmp.lt.s32.totalorder %v3823_v36, 0  ;;  %v1166_v48 = vsel %vm1160_vm12, %v1163_v59, %v1165_v49 }
 0x191   : > { %v1170_v1 = vsel %vm1160_vm12, %v1167_v29, %v1169_v45  ;;  %v1173_v4 = vsel %vm1161_vm8, %v1155_v32, %v1172_v22  ;;  %v1301_v14 = vsel %vm3824_vm13, 0, %v3823_v36  ;;  %v1182_v37 = vmul.u32 %v1175_v18, %v1166_v48 }
 0x192   : > { %v4071_v21 = vpop.eup %4070  ;;  %v1174_v19 = vsel %vm1160_vm12, %v1171_v12, %v1173_v4  ;;  %v5236_v7 = vmul.u32.u64.low %v1175_v18, %v1170_v1  ;;  %v5237_v0 = vmul.u32.u64.high %v1175_v18, %v1170_v1, %v5236_v7  ;;  %v1302_v63 = vsub.s32 32, %v1301_v14 }
 0x193   : > { %v4073_v20 = vpop.eup %4072  ;;  %v1020_v31 = vxor.u32 2147483648, %v4071_v21  ;;  %v1303_v15 = vshll.u32 %v5205_v26, %v1301_v14  ;;  %v1306_v9 = vsub.s32 4294967266, %v1301_v14  ;;  %v1446_v44 = vadd.s32 1, %v3829_v61 }
 0x194   : > { %v1017_v51 = vxor.u32 2147483648, %v4073_v20  ;;  %v5241_v23 = vmul.u32.u64.low %v1175_v18, %v1174_v19  ;;  %v5242_v10 = vmul.u32.u64.high %v1175_v18, %v1174_v19, %v5241_v23  ;;  %v1304_v62 = vshrl.u32 %v1286_v38, %v1302_v63 }
 0x195   : > { %v1021_v13 = vsel %vm1019_vm2, %v1020_v31, %v4073_v20  ;;  %v2692_v55 = vsel %vm2690_vm3, %v1020_v31, %v4073_v20  ;;  %v1307_v33 = vadd.s32 127, %v1306_v9  ;;  %v1185_v27 = vadd.s32 1, %v5237_v0 }
 0x196   : > { %v1018_v5 = vsel %vm1016_vm5, %v4071_v21, %v1017_v51  ;;  %v2689_v26 = vsel %vm2687_vm6, %v4071_v21, %v1017_v51  ;;  %vm1447_vm14 = vcmp.gt.s32.totalorder %v1446_v44, 0  ;;  %v1305_v16 = vor.u32 %v1304_v62, %v1303_v15 }
 0x197   : > { %v1022_v47 = vsel %vm1015_vm9, %v1018_v5, %v1021_v13  ;;  %v2693_v24 = vsel %vm2686_vm10, %v2689_v26, %v2692_v55  ;;  %v1308_v25 = vshll.u32 %v1307_v33, 23  ;;  %vm1184_vm15 = vc.u32 %v5242_v10, %v5236_v7 }
 0x198   : > { %v1023_v41 = vsel %vm1013_vm11, nan, %v1022_v47  ;;  %v2694_v38 = vsel %vm1013_vm11, nan, %v2693_v24  ;;  %v1186_v8 = vsel %vm1184_vm15, %v1185_v27, %v5237_v0  ;;  %v1436_v11 = vand.u32 2147483647, %v5183_v35 }
 0x199   : > { %1957 = vst [vmem:[%s4601_s6 + $0x30] sm:$0xff] %v1023_v41  ;;  %3637 = vst [vmem:[%s4606_s7 + $0x30] sm:$0xff] %v2694_v38  ;;  %v1309_v32 = vor.u32 4788187, %v1308_v25  ;;  %v1448_v40 = vsel %vm1447_vm14, %v1446_v44, 0  ;;  %v2996_v17 = vadd.s32 3, %v1319_v52  ;;  %v1187_v53 = vadd.s32 %v1186_v8, %v1182_v37 }
 0x19a   : > { %v1450_v34 = vand.u32 31, %v1448_v40  ;;  %v1312_v59 = vcvt.s32.f32 %v1305_v16  ;;  %v1443_v18 = vand.u32 8388607, %v1436_v11  ;;  %v5270_v36 = vmul.f32 %v4900_v30, %v254_v2 }
 0x19b   : > { %v1310_v46 = vand.u32 2147483647, %v1309_v32  ;;  %v1188_v43 = vadd.s32 536870912, %v1187_v53  ;;  %v5272_v39 = vand.u32 3, %v1319_v52  ;;  %v5274_v12 = vand.u32 3, %v2996_v17 }
 0x19c   : > { %v1451_v49 = vsub.s32 32, %v1450_v34  ;;  %vm1129_vm2 = vcmp.lt.s32.totalorder %v5103_v28, 0  ;;  %v5281_v14 = vshrl.u32 %v1448_v40, 5  ;;  %v1453_v30 = vshll.u32 %v4205_v50, %v1450_v34 }
 0x19d   : > { %v1313_v29 = vmul.f32 %v1312_v59, %v1310_v46  ;;  %v1189_v45 = vshrl.u32 %v1188_v43, 30  ;;  %v1456_v0 = vshll.u32 %v4206_v54, %v1450_v34  ;;  %v1459_v20 = vshll.u32 %v4207_v56, %v1450_v34 }
 0x19e   : > { %v1454_v22 = vshrl.u32 %v4206_v54, %v1451_v49  ;;  %v1457_v48 = vshrl.u32 %v4207_v56, %v1451_v49  ;;  %v1460_v1 = vshrl.u32 %v4208_v58, %v1451_v49  ;;  %v1463_v4 = vshrl.u32 %v4209_v60, %v1451_v49 }
 0x19f   : > { %v1314_v61 = vxor.u32 2147483648, %v1313_v29  ;;  %v1190_v21 = vshll.u32 %v1189_v45, 30  ;;  %v1466_v52 = vshrl.u32 %v4210_v3, %v1451_v49  ;;  %v1462_v31 = vshll.u32 %v4208_v58, %v1450_v34 }
 0x1a0   : > { %v1455_v9 = vor.u32 %v1454_v22, %v1453_v30  ;;  %v1465_v51 = vshll.u32 %v4209_v60, %v1450_v34  ;;  %v1458_v23 = vor.u32 %v1457_v48, %v1456_v0  ;;  %v1461_v44 = vor.u32 %v1460_v1, %v1459_v20 }
 0x1a1   : > { %v1315_v19 = vsel %vm1232_vm0, %v1314_v61, %v1313_v29  ;;  %v5293_v15 = vsub.s32 %v1187_v53, %v1190_v21  ;;  %v1464_v13 = vor.u32 %v1463_v4, %v1462_v31  ;;  %v1336_v33 = vand.u32 2139095040, %v5270_v36 }
 0x1a2   : > { %v1318_v63 = vsel %vm5195_vm1, %v4991_v42, %v1315_v19  ;;  %v1467_v62 = vor.u32 %v1466_v52, %v1465_v51  ;;  %vm5300_vm0 = vcmp.le.f32.partialorder %v1127_v6, 0.7853982  ;;  %v1213_v5 = vsub.s32 4, %v1189_v45 }
 0x1a3   : > { %4074 = vcosq.f32 %v1318_v63  ;;  %v1193_v55 = vsub.s32 0, %v5293_v15  ;;  %v1444_v26 = vor.u32 8388608, %v1443_v18  ;;  %v1452_v27 = vshrl.u32 %v4205_v50, %v1451_v49 }
 0x1a4   : > { %4076 = vsinq.f32 %v1318_v63  ;;  %vm1468_vm1 = vcmp.lt.s32.totalorder %v5281_v14, 1  ;;  %vm1470_vm3 = vcmp.lt.s32.totalorder %v5281_v14, 3  ;;  %vm1471_vm4 = vcmp.lt.s32.totalorder %v5281_v14, 4 }
 0x1a5   : > { %v3818_v47 = vmin.u32 %v1193_v55, %v5293_v15  ;;  %vm1328_vm5 = vcmp.eq.s32.totalorder %v5272_v39, 2  ;;  %v1473_v24 = vsel %vm1471_vm4, %v1461_v44, 2102212464  ;;  %v1476_v6 = vsel %vm1468_vm1, %v1455_v9, %v1458_v23 }
 0x1a6   : > { %v1477_v16 = vsel %vm1471_vm4, %v1464_v13, 920167782  ;;  %v1480_v25 = vsel %vm1468_vm1, %v1458_v23, %v1461_v44  ;;  %vm1325_vm6 = vcmp.eq.s32.totalorder %v5272_v39, 0  ;;  %vm2999_vm7 = vcmp.eq.s32.totalorder %v5274_v12, 0 }
 0x1a7   : > { %v1195_v41 = vclz %v3818_v47  ;;  %v1478_v38 = vsel %vm1470_vm3, %v1461_v44, %v1477_v16  ;;  %v1481_v37 = vsel %vm1471_vm4, %v1467_v62, 1326507024  ;;  %v1337_v32 = vshrl.u32 %v1336_v33, 23 }
 0x1a8   : > { %vm1324_vm8 = vcmp.lt.s32.totalorder %v5272_v39, 2  ;;  %vm2998_vm9 = vcmp.lt.s32.totalorder %v5274_v12, 2  ;;  %vm3002_vm10 = vcmp.eq.s32.totalorder %v5274_v12, 2  ;;  %v1214_v8 = vsel %vm1129_vm2, %v1213_v5, %v1189_v45 }
 0x1a9   : > { %vm1469_vm11 = vcmp.lt.s32.totalorder %v5281_v14, 2  ;;  %v1484_v40 = vshll.u32 %v1444_v26, 8  ;;  %vm1322_vm12 = vweird.f32 %v4991_v42  ;;  %v3819_v17 = vadd.s32 4294967294, %v1195_v41 }
 0x1aa   : > { %v1472_v53 = vsel %vm1468_vm1, %v1452_v27, %v1455_v9  ;;  %v1479_v34 = vsel %vm1469_vm11, %v1476_v6, %v1478_v38  ;;  %v1482_v2 = vsel %vm1470_vm3, %v1464_v13, %v1481_v37  ;;  %v1474_v46 = vsel %vm1470_vm3, %v1458_v23, %v1473_v24  ;;  %v269_v37 = vpop.permute.xlu1 %268 }
 0x1ab   : > { %v1483_v59 = vsel %vm1469_vm11, %v1480_v25, %v1482_v2  ;;  %v5335_v43 = vmul.u32.u64.low %v1484_v40, %v1479_v34  ;;  %v5336_v49 = vmul.u32.u64.high %v1484_v40, %v1479_v34, %v5335_v43  ;;  %vm3820_vm13 = vcmp.lt.s32.totalorder %v3819_v17, 0 }
 0x1ac   : > { %v5339_v29 = vmul.u32.u64.low %v1484_v40, %v1483_v59  ;;  %v5340_v18 = vmul.u32.u64.high %v1484_v40, %v1483_v59, %v5339_v29  ;;  %v3825_v45 = vadd.s32 4294967169, %v1337_v32  ;;  %v1183_v61 = vadd.s32 %v5236_v7, %v5242_v10 }
 0x1ad   : > { %v4075_v22 = vpop.eup %4074  ;;  %v1198_v48 = vsel %vm3820_vm13, 0, %v3819_v17  ;;  %v1216_v1 = vsel %vm5300_vm0, 0, %v1214_v8  ;;  %v1333_v4 = vand.u32 2147483647, %v5270_v36  ;;  %v1475_v0 = vsel %vm1469_vm11, %v1472_v53, %v1474_v46  ;;  %v5383_v46 = vld [vmem:[%s5967_s1] ss:$0 sm:$0xff] }
 0x1ae   : > { %v4077_v21 = vpop.eup %4076  ;;  %v1329_v30 = vxor.u32 2147483648, %v4075_v22  ;;  %v1199_v52 = vsub.s32 32, %v1198_v48  ;;  %v1203_v19 = vsub.s32 4294967266, %v1198_v48  ;;  %v1200_v31 = vshll.u32 %v5293_v15, %v1198_v48 }
 0x1af   : > { %v1326_v20 = vxor.u32 2147483648, %v4077_v21  ;;  %v1494_v63 = vadd.s32 1, %v5336_v49  ;;  %v1343_v9 = vadd.s32 1, %v3825_v45  ;;  %v1491_v15 = vmul.u32 %v1484_v40, %v1475_v0 }
 0x1b0   : > { %v1330_v7 = vsel %vm1328_vm5, %v1329_v30, %v4077_v21  ;;  %v3004_v10 = vsel %vm3002_vm10, %v1329_v30, %v4077_v21  ;;  %v1201_v51 = vshrl.u32 %v1183_v61, %v1199_v52  ;;  %v1204_v23 = vadd.s32 127, %v1203_v19 }
 0x1b1   : > { %v1327_v14 = vsel %vm1325_vm6, %v4075_v22, %v1326_v20  ;;  %v3001_v44 = vsel %vm2999_vm7, %v4075_v22, %v1326_v20  ;;  %vm1493_vm14 = vc.u32 %v5340_v18, %v5335_v43  ;;  %vm1344_vm15 = vcmp.gt.s32.totalorder %v1343_v9, 0 }
 0x1b2   : > { %v1331_v13 = vsel %vm1324_vm8, %v1327_v14, %v1330_v7  ;;  %v3005_v55 = vsel %vm2998_vm9, %v3001_v44, %v3004_v10  ;;  %v1202_v62 = vor.u32 %v1201_v51, %v1200_v31  ;;  %v1205_v33 = vshll.u32 %v1204_v23, 23 }
 0x1b3   : > { %v1332_v5 = vsel %vm1322_vm12, nan, %v1331_v13  ;;  %v3006_v26 = vsel %vm1322_vm12, nan, %v3005_v55  ;;  %v1495_v27 = vsel %vm1493_vm14, %v1494_v63, %v5336_v49  ;;  %v2892_v24 = vadd.s32 3, %v1216_v1 }
 0x1b4   : > { %1960 = vst [vmem:[%s4601_s6 + $0x48] sm:$0xff] %v1332_v5  ;;  %3640 = vst [vmem:[%s4606_s7 + $0x48] sm:$0xff] %v3006_v26  ;;  %v1206_v47 = vor.u32 4788187, %v1205_v33  ;;  %v1496_v39 = vadd.s32 %v1495_v27, %v1491_v15  ;;  %v1345_v6 = vsel %vm1344_vm15, %v1343_v9, 0  ;;  %v1209_v41 = vcvt.s32.f32 %v1202_v62 }
 0x1b5   : > { %v1340_v12 = vand.u32 8388607, %v1333_v4  ;;  %v1347_v16 = vand.u32 31, %v1345_v6  ;;  %v5374_v8 = vand.u32 3, %v1216_v1  ;;  %v5376_v40 = vand.u32 3, %v2892_v24 }
 0x1b6   : > { %v1207_v25 = vand.u32 2147483647, %v1206_v47  ;;  %v1497_v38 = vadd.s32 536870912, %v1496_v39  ;;  %v5386_v59 = vmul.f32 %v5383_v46, %v269_v37  ;;  %v5390_v61 = vshrl.u32 %v1345_v6, 5 }
 0x1b7   : > { %v1348_v32 = vsub.s32 32, %v1347_v16  ;;  %v1341_v53 = vor.u32 8388608, %v1340_v12  ;;  %v1350_v48 = vshll.u32 %v4205_v50, %v1347_v16  ;;  %v1353_v1 = vshll.u32 %v4206_v54, %v1347_v16 }
 0x1b8   : > { %v1210_v42 = vmul.f32 %v1209_v41, %v1207_v25  ;;  %v1498_v17 = vshrl.u32 %v1497_v38, 30  ;;  %v1356_v21 = vshll.u32 %v4207_v56, %v1347_v16  ;;  %v1359_v19 = vshll.u32 %v4208_v58, %v1347_v16 }
 0x1b9   : > { %v1351_v34 = vshrl.u32 %v4206_v54, %v1348_v32  ;;  %v1354_v2 = vshrl.u32 %v4207_v56, %v1348_v32  ;;  %v1357_v45 = vshrl.u32 %v4208_v58, %v1348_v32  ;;  %v1360_v22 = vshrl.u32 %v4209_v60, %v1348_v32 }
 0x1ba   : > { %v1211_v49 = vxor.u32 2147483648, %v1210_v42  ;;  %v1499_v29 = vshll.u32 %v1498_v17, 30  ;;  %v1363_v0 = vshrl.u32 %v4210_v3, %v1348_v32  ;;  %v1362_v9 = vshll.u32 %v4209_v60, %v1347_v16 }
 0x1bb   : > { %v1352_v31 = vor.u32 %v1351_v34, %v1350_v48  ;;  %v1355_v63 = vor.u32 %v1354_v2, %v1353_v1  ;;  %v1358_v10 = vor.u32 %v1357_v45, %v1356_v21  ;;  %v1361_v51 = vor.u32 %v1360_v22, %v1359_v19 }
 0x1bc   : > { %v1212_v30 = vsel %vm1129_vm2, %v1211_v49, %v1210_v42  ;;  %v5397_v52 = vsub.s32 %v1496_v39, %v1499_v29  ;;  %v1522_v23 = vsub.s32 4, %v1498_v17  ;;  %vm5408_vm2 = vcmp.le.f32.partialorder %v1436_v11, 0.7853982 }
 0x1bd   : > { %v1215_v20 = vsel %vm5300_vm0, %v5103_v28, %v1212_v30  ;;  %vm1438_vm1 = vcmp.lt.s32.totalorder %v5183_v35, 0  ;;  %v1364_v44 = vor.u32 %v1363_v0, %v1362_v9  ;;  %v5414_v15 = vshll.u32 %v1341_v53, 8 }
 0x1be   : > { %4078 = vcosq.f32 %v1215_v20  ;;  %v1502_v7 = vsub.s32 0, %v5397_v52  ;;  %v1349_v13 = vshrl.u32 %v4205_v50, %v1348_v32  ;;  %vm1365_vm0 = vcmp.lt.s32.totalorder %v5390_v61, 1 }
 0x1bf   : > { %4080 = vsinq.f32 %v1215_v20  ;;  %vm1368_vm3 = vcmp.lt.s32.totalorder %v5390_v61, 4  ;;  %v1645_v55 = vand.u32 2139095040, %v5386_v59  ;;  %vm1225_vm4 = vcmp.eq.s32.totalorder %v5374_v8, 2 }
 0x1c0   : > { %v3830_v57 = vmin.u32 %v1502_v7, %v5397_v52  ;;  %vm2898_vm5 = vcmp.eq.s32.totalorder %v5376_v40, 2  ;;  %v1370_v62 = vsel %vm1368_vm3, %v1358_v10, 2102212464  ;;  %v1373_v33 = vsel %vm1365_vm0, %v1352_v31, %v1355_v63 }
 0x1c1   : > { %v1374_v5 = vsel %vm1368_vm3, %v1361_v51, 920167782  ;;  %vm1222_vm6 = vcmp.eq.s32.totalorder %v5374_v8, 0  ;;  %vm2895_vm7 = vcmp.eq.s32.totalorder %v5376_v40, 0  ;;  %v1523_v26 = vsel %vm1438_vm1, %v1522_v23, %v1498_v17 }
 0x1c2   : > { %v1504_v11 = vclz %v3830_v57  ;;  %vm1366_vm8 = vcmp.lt.s32.totalorder %v5390_v61, 2  ;;  %vm1367_vm9 = vcmp.lt.s32.totalorder %v5390_v61, 3  ;;  %v1377_v27 = vsel %vm1365_vm0, %v1355_v63, %v1358_v10 }
 0x1c3   : > { %vm1221_vm10 = vcmp.lt.s32.totalorder %v5374_v8, 2  ;;  %vm2894_vm11 = vcmp.lt.s32.totalorder %v5376_v40, 2  ;;  %v1369_v24 = vsel %vm1365_vm0, %v1349_v13, %v1352_v31  ;;  %v1375_v39 = vsel %vm1367_vm9, %v1358_v10, %v1374_v5 }
 0x1c4   : > { %v3831_v47 = vadd.s32 4294967294, %v1504_v11  ;;  %v1378_v6 = vsel %vm1368_vm3, %v1364_v44, 1326507024  ;;  %vm1219_vm12 = vweird.f32 %v5103_v28  ;;  %v1371_v12 = vsel %vm1367_vm9, %v1355_v63, %v1370_v62  ;;  %v264_v62 = vpop.permute.xlu0 %263 }
 0x1c5   : > { %v1376_v16 = vsel %vm1366_vm8, %v1373_v33, %v1375_v39  ;;  %v1379_v25 = vsel %vm1367_vm9, %v1361_v51, %v1378_v6  ;;  %v1646_v41 = vshrl.u32 %v1645_v55, 23  ;;  %v1492_v49 = vadd.s32 %v5335_v43, %v5340_v18 }
 0x1c6   : > { %vm3832_vm13 = vcmp.lt.s32.totalorder %v3831_v47, 0  ;;  %v1380_v38 = vsel %vm1366_vm8, %v1377_v27, %v1379_v25  ;;  %v5448_v37 = vmul.u32.u64.low %v5414_v15, %v1376_v16  ;;  %v5449_v32 = vmul.u32.u64.high %v5414_v15, %v1376_v16, %v5448_v37 }
 0x1c7   : > { %v1507_v42 = vsel %vm3832_vm13, 0, %v3831_v47  ;;  %v5453_v17 = vmul.u32.u64.low %v5414_v15, %v1380_v38  ;;  %v5454_v53 = vmul.u32.u64.high %v5414_v15, %v1380_v38, %v5453_v17  ;;  %v3837_v34 = vadd.s32 4294967169, %v1646_v41 }
 0x1c8   : > { %v4079_v2 = vpop.eup %4078  ;;  %v1508_v29 = vsub.s32 32, %v1507_v42  ;;  %v1512_v45 = vsub.s32 4294967266, %v1507_v42  ;;  %v1642_v22 = vand.u32 2147483647, %v5386_v59  ;;  %v1509_v21 = vshll.u32 %v5397_v52, %v1507_v42 }
 0x1c9   : > { %v4081_v48 = vpop.eup %4080  ;;  %v1226_v1 = vxor.u32 2147483648, %v4079_v2  ;;  %v1525_v30 = vsel %vm5408_vm2, 0, %v1523_v26  ;;  %v1372_v19 = vsel %vm1366_vm8, %v1369_v24, %v1371_v12  ;;  %v1391_v63 = vadd.s32 1, %v5449_v32 }
 0x1ca   : > { %v1223_v0 = vxor.u32 2147483648, %v4081_v48  ;;  %v1510_v20 = vshrl.u32 %v1492_v49, %v1508_v29  ;;  %v1513_v31 = vadd.s32 127, %v1512_v45  ;;  %vm1390_vm14 = vc.u32 %v5454_v53, %v5448_v37 }
 0x1cb   : > { %v1227_v43 = vsel %vm1225_vm4, %v1226_v1, %v4081_v48  ;;  %v2900_v18 = vsel %vm2898_vm5, %v1226_v1, %v4081_v48  ;;  %v1652_v52 = vadd.s32 1, %v3837_v34  ;;  %v1388_v57 = vmul.u32 %v5414_v15, %v1372_v19 }
 0x1cc   : > { %v1224_v61 = vsel %vm1222_vm6, %v4079_v2, %v1223_v0  ;;  %v2897_v9 = vsel %vm2895_vm7, %v4079_v2, %v1223_v0  ;;  %v1511_v7 = vor.u32 %v1510_v20, %v1509_v21  ;;  %v1514_v10 = vshll.u32 %v1513_v31, 23 }
 0x1cd   : > { %v1228_v51 = vsel %vm1221_vm10, %v1224_v61, %v1227_v43  ;;  %v2901_v23 = vsel %vm2894_vm11, %v2897_v9, %v2900_v18  ;;  %v1392_v44 = vsel %vm1390_vm14, %v1391_v63, %v5449_v32  ;;  %vm1653_vm15 = vcmp.gt.s32.totalorder %v1652_v52, 0 }
 0x1ce   : > { %v1229_v13 = vsel %vm1219_vm12, nan, %v1228_v51  ;;  %v2902_v55 = vsel %vm1219_vm12, nan, %v2901_v23  ;;  %v1515_v11 = vor.u32 4788187, %v1514_v10  ;;  %v1393_v33 = vadd.s32 %v1392_v44, %v1388_v57 }
 0x1cf   : > { %1959 = vst [vmem:[%s4601_s6 + $0x40] sm:$0xff] %v1229_v13  ;;  %3639 = vst [vmem:[%s4606_s7 + $0x40] sm:$0xff] %v2902_v55  ;;  %v1518_v5 = vcvt.s32.f32 %v1511_v7  ;;  %v3204_v40 = vadd.s32 3, %v1525_v30  ;;  %v1654_v26 = vsel %vm1653_vm15, %v1652_v52, 0  ;;  %v1649_v15 = vand.u32 8388607, %v1642_v22 }
 0x1d0   : > { %v1516_v8 = vand.u32 2147483647, %v1515_v11  ;;  %v1394_v27 = vadd.s32 536870912, %v1393_v33  ;;  %v1656_v47 = vand.u32 31, %v1654_v26  ;;  %v5490_v24 = vmul.f32 %v5383_v46, %v264_v62 }
 0x1d1   : > { %v5492_v16 = vand.u32 3, %v1525_v30  ;;  %v5494_v25 = vand.u32 3, %v3204_v40  ;;  %v1650_v38 = vor.u32 8388608, %v1649_v15  ;;  %vm1335_vm0 = vcmp.lt.s32.totalorder %v5270_v36, 0 }
 0x1d2   : > { %v1519_v28 = vmul.f32 %v1518_v5, %v1516_v8  ;;  %v1395_v39 = vshrl.u32 %v1394_v27, 30  ;;  %v1657_v6 = vsub.s32 32, %v1656_v47  ;;  %v1542_v32 = vand.u32 2139095040, %v5490_v24 }
 0x1d3   : > { %v1665_v45 = vshll.u32 %v4207_v56, %v1656_v47  ;;  %v1655_v1 = vshrl.u32 %v1654_v26, 5  ;;  %v1659_v21 = vshll.u32 %v4205_v50, %v1656_v47  ;;  %v1662_v30 = vshll.u32 %v4206_v54, %v1656_v47 }
 0x1d4   : > { %v1520_v12 = vxor.u32 2147483648, %v1519_v28  ;;  %v1396_v41 = vshll.u32 %v1395_v39, 30  ;;  %v1660_v17 = vshrl.u32 %v4206_v54, %v1657_v6  ;;  %v1663_v34 = vshrl.u32 %v4207_v56, %v1657_v6 }
 0x1d5   : > { %v1666_v2 = vshrl.u32 %v4208_v58, %v1657_v6  ;;  %v1669_v48 = vshrl.u32 %v4209_v60, %v1657_v6  ;;  %v1668_v20 = vshll.u32 %v4208_v58, %v1656_v47  ;;  %v1671_v63 = vshll.u32 %v4209_v60, %v1656_v47 }
 0x1d6   : > { %v1521_v42 = vsel %vm1438_vm1, %v1520_v12, %v1519_v28  ;;  %v5506_v29 = vsub.s32 %v1393_v33, %v1396_v41  ;;  %v1661_v14 = vor.u32 %v1660_v17, %v1659_v21  ;;  %v1664_v31 = vor.u32 %v1663_v34, %v1662_v30 }
 0x1d7   : > { %v1524_v49 = vsel %vm5408_vm2, %v5183_v35, %v1521_v42  ;;  %v1667_v0 = vor.u32 %v1666_v2, %v1665_v45  ;;  %v1672_v43 = vshrl.u32 %v4210_v3, %v1657_v6  ;;  %v1389_v18 = vadd.s32 %v5448_v37, %v5454_v53 }
 0x1d8   : > { %4082 = vcosq.f32 %v1524_v49  ;;  %v1399_v19 = vsub.s32 0, %v5506_v29  ;;  %v1419_v61 = vsub.s32 4, %v1395_v39  ;;  %v1670_v9 = vor.u32 %v1669_v48, %v1668_v20 }
 0x1d9   : > { %4084 = vsinq.f32 %v1524_v49  ;;  %vm1534_vm2 = vcmp.eq.s32.totalorder %v5492_v16, 2  ;;  %vm3210_vm1 = vcmp.eq.s32.totalorder %v5494_v25, 2  ;;  %v1658_v7 = vshrl.u32 %v4205_v50, %v1657_v6 }
 0x1da   : > { %v3826_v52 = vmin.u32 %v1399_v19, %v5506_v29  ;;  %v1673_v10 = vor.u32 %v1672_v43, %v1671_v63  ;;  %vm1677_vm3 = vcmp.lt.s32.totalorder %v1655_v1, 4  ;;  %v1543_v51 = vshrl.u32 %v1542_v32, 23 }
 0x1db   : > { %vm1531_vm4 = vcmp.eq.s32.totalorder %v5492_v16, 0  ;;  %vm3207_vm5 = vcmp.eq.s32.totalorder %v5494_v25, 0  ;;  %vm1674_vm6 = vcmp.lt.s32.totalorder %v1655_v1, 1  ;;  %vm1676_vm7 = vcmp.lt.s32.totalorder %v1655_v1, 3 }
 0x1dc   : > { %v1401_v23 = vclz %v3826_v52  ;;  %v1679_v37 = vsel %vm1677_vm3, %v1667_v0, 2102212464  ;;  %vm1530_vm8 = vcmp.lt.s32.totalorder %v5492_v16, 2  ;;  %vm3206_vm9 = vcmp.lt.s32.totalorder %v5494_v25, 2 }
 0x1dd   : > { %v1678_v53 = vsel %vm1674_vm6, %v1658_v7, %v1661_v14  ;;  %v1680_v57 = vsel %vm1676_vm7, %v1664_v31, %v1679_v37  ;;  %v1682_v44 = vsel %vm1674_vm6, %v1661_v14, %v1664_v31  ;;  %v1690_v13 = vshll.u32 %v1650_v38, 8 }
 0x1de   : > { %vm1528_vm10 = vweird.f32 %v5183_v35  ;;  %v3827_v55 = vadd.s32 4294967294, %v1401_v23  ;;  %v1420_v11 = vsel %vm1335_vm0, %v1419_v61, %v1395_v39  ;;  %v1683_v62 = vsel %vm1677_vm3, %v1670_v9, 920167782 }
 0x1df   : > { %v1686_v33 = vsel %vm1674_vm6, %v1664_v31, %v1667_v0  ;;  %vm1675_vm11 = vcmp.lt.s32.totalorder %v1655_v1, 2  ;;  %v1684_v8 = vsel %vm1676_vm7, %v1667_v0, %v1683_v62  ;;  %v1687_v5 = vsel %vm1677_vm3, %v1673_v10, 1326507024 }
 0x1e0   : > { %v3833_v40 = vadd.s32 4294967169, %v1543_v51  ;;  %vm3828_vm12 = vcmp.lt.s32.totalorder %v3827_v55, 0  ;;  %v1681_v26 = vsel %vm1675_vm11, %v1678_v53, %v1680_v57  ;;  %v1685_v27 = vsel %vm1675_vm11, %v1682_v44, %v1684_v8 }
 0x1e1   : > { %v1688_v15 = vsel %vm1676_vm7, %v1670_v9, %v1687_v5  ;;  %v1404_v28 = vsel %vm3828_vm12, 0, %v3827_v55  ;;  %v5535_v12 = vmul.u32.u64.low %v1690_v13, %v1685_v27  ;;  %v5536_v41 = vmul.u32.u64.high %v1690_v13, %v1685_v27, %v5535_v12 }
 0x1e2   : > { %v4083_v47 = vpop.eup %4082  ;;  %v1689_v6 = vsel %vm1675_vm11, %v1686_v33, %v1688_v15  ;;  %v1405_v32 = vsub.s32 32, %v1404_v28  ;;  %v1406_v42 = vshll.u32 %v5506_v29, %v1404_v28  ;;  %v1409_v17 = vsub.s32 4294967266, %v1404_v28 }
 0x1e3   : > { %v4085_v39 = vpop.eup %4084  ;;  %v1535_v38 = vxor.u32 2147483648, %v4083_v47  ;;  %v5540_v2 = vmul.u32.u64.low %v1690_v13, %v1689_v6  ;;  %v5541_v49 = vmul.u32.u64.high %v1690_v13, %v1689_v6, %v5540_v2  ;;  %v1549_v45 = vadd.s32 1, %v3833_v40 }
 0x1e4   : > { %v1532_v34 = vxor.u32 2147483648, %v4085_v39  ;;  %v1407_v21 = vshrl.u32 %v1389_v18, %v1405_v32  ;;  %v1410_v30 = vadd.s32 127, %v1409_v17  ;;  %v1700_v0 = vadd.s32 1, %v5536_v41 }
 0x1e5   : > { %v1536_v48 = vsel %vm1534_vm2, %v1535_v38, %v4085_v39  ;;  %v3212_v1 = vsel %vm3210_vm1, %v1535_v38, %v4085_v39  ;;  %vm1550_vm13 = vcmp.gt.s32.totalorder %v1549_v45, 0  ;;  %v1697_v52 = vmul.u32 %v1690_v13, %v1681_v26 }
 0x1e6   : > { %v1533_v19 = vsel %vm1531_vm4, %v4083_v47, %v1532_v34  ;;  %v3209_v29 = vsel %vm3207_vm5, %v4083_v47, %v1532_v34  ;;  %v1408_v31 = vor.u32 %v1407_v21, %v1406_v42  ;;  %v1411_v63 = vshll.u32 %v1410_v30, 23  ;;  %v279_v34 = vpop.permute.xlu1 %278 }
 0x1e7   : > { %v1537_v20 = vsel %vm1530_vm8, %v1533_v19, %v1536_v48  ;;  %v3213_v14 = vsel %vm3206_vm9, %v3209_v29, %v3212_v1  ;;  %vm1699_vm14 = vc.u32 %v5541_v49, %v5535_v12  ;;  %v1539_v25 = vand.u32 2147483647, %v5490_v24 }
 0x1e8   : > { %v1538_v43 = vsel %vm1528_vm10, nan, %v1537_v20  ;;  %v3214_v18 = vsel %vm1528_vm10, nan, %v3213_v14  ;;  %v1412_v61 = vor.u32 4788187, %v1411_v63  ;;  %v1701_v16 = vsel %vm1699_vm14, %v1700_v0, %v5536_v41 }
 0x1e9   : > { %1962 = vst [vmem:[%s4601_s6 + $0x58] sm:$0xff] %v1538_v43  ;;  %3642 = vst [vmem:[%s4606_s7 + $0x58] sm:$0xff] %v3214_v18  ;;  %v1551_v9 = vsel %vm1550_vm13, %v1549_v45, 0  ;;  %vm5568_vm15 = vcmp.le.f32.partialorder %v1333_v4, 0.7853982  ;;  %v1702_v35 = vadd.s32 %v1701_v16, %v1697_v52  ;;  %v1415_v23 = vcvt.s32.f32 %v1408_v31 }
 0x1ea   : > { %v1553_v10 = vand.u32 31, %v1551_v9  ;;  %v1413_v51 = vand.u32 2147483647, %v1412_v61  ;;  %v1422_v37 = vsel %vm5568_vm15, 0, %v1420_v11  ;;  %v1546_v13 = vand.u32 8388607, %v1539_v25 }
 0x1eb   : > { %v1703_v53 = vadd.s32 536870912, %v1702_v35  ;;  %v5576_v55 = vand.u32 3, %v1422_v37  ;;  %v3100_v62 = vadd.s32 3, %v1422_v37  ;;  %v5585_v27 = vshrl.u32 %v1551_v9, 5 }
 0x1ec   : > { %v1554_v57 = vsub.s32 32, %v1553_v10  ;;  %v1416_v44 = vmul.f32 %v1415_v23, %v1413_v51  ;;  %v1556_v15 = vshll.u32 %v4205_v50, %v1553_v10  ;;  %v1559_v6 = vshll.u32 %v4206_v54, %v1553_v10 }
 0x1ed   : > { %v5578_v4 = vshrl.u32 %v1703_v53, 30  ;;  %v1562_v41 = vshll.u32 %v4207_v56, %v1553_v10  ;;  %v1565_v39 = vshll.u32 %v4208_v58, %v1553_v10  ;;  %v1568_v17 = vshll.u32 %v4209_v60, %v1553_v10 }
 0x1ee   : > { %v1557_v33 = vshrl.u32 %v4206_v54, %v1554_v57  ;;  %v1417_v8 = vxor.u32 2147483648, %v1416_v44  ;;  %v1560_v5 = vshrl.u32 %v4207_v56, %v1554_v57  ;;  %v1563_v40 = vshrl.u32 %v4208_v58, %v1554_v57 }
 0x1ef   : > { %v1566_v11 = vshrl.u32 %v4209_v60, %v1554_v57  ;;  %v1705_v26 = vshll.u32 %v5578_v4, 30  ;;  %v1569_v47 = vshrl.u32 %v4210_v3, %v1554_v57  ;;  %v3101_v30 = vand.u32 3, %v3100_v62 }
 0x1f0   : > { %v1418_v28 = vsel %vm1335_vm0, %v1417_v8, %v1416_v44  ;;  %v1558_v42 = vor.u32 %v1557_v33, %v1556_v15  ;;  %v1561_v2 = vor.u32 %v1560_v5, %v1559_v6  ;;  %v1564_v45 = vor.u32 %v1563_v40, %v1562_v41 }
 0x1f1   : > { %v1421_v38 = vsel %vm5568_vm15, %v5270_v36, %v1418_v28  ;;  %v5597_v32 = vsub.s32 %v1702_v35, %v1705_v26  ;;  %v1567_v48 = vor.u32 %v1566_v11, %v1565_v39  ;;  %v1570_v21 = vor.u32 %v1569_v47, %v1568_v17 }
 0x1f2   : > { %4086 = vcosq.f32 %v1421_v38  ;;  %vm1644_vm0 = vcmp.lt.s32.totalorder %v5386_v59, 0  ;;  %v1547_v19 = vor.u32 8388608, %v1546_v13  ;;  %v5603_v29 = vmul.f32 %v5383_v46, %v279_v34 }
 0x1f3   : > { %4088 = vsinq.f32 %v1421_v38  ;;  %v1708_v1 = vsub.s32 0, %v5597_v32  ;;  %v1555_v20 = vshrl.u32 %v4205_v50, %v1554_v57  ;;  %vm1571_vm2 = vcmp.lt.s32.totalorder %v5585_v27, 1 }
 0x1f4   : > { %vm1574_vm1 = vcmp.lt.s32.totalorder %v5585_v27, 4  ;;  %vm1431_vm3 = vcmp.eq.s32.totalorder %v5576_v55, 2  ;;  %vm1573_vm4 = vcmp.lt.s32.totalorder %v5585_v27, 3  ;;  %v1579_v14 = vsel %vm1571_vm2, %v1558_v42, %v1561_v2 }
 0x1f5   : > { %v3838_v0 = vmin.u32 %v1708_v1, %v5597_v32  ;;  %v1580_v31 = vsel %vm1574_vm1, %v1567_v48, 920167782  ;;  %v1583_v63 = vsel %vm1571_vm2, %v1561_v2, %v1564_v45  ;;  %vm1428_vm5 = vcmp.eq.s32.totalorder %v5576_v55, 0  ;;  %v274_v1 = vpop.permute.xlu0 %273 }
 0x1f6   : > { %v1576_v18 = vsel %vm1574_vm1, %v1564_v45, 2102212464  ;;  %v1581_v52 = vsel %vm1573_vm4, %v1564_v45, %v1580_v31  ;;  %v1584_v61 = vsel %vm1574_vm1, %v1570_v21, 1326507024  ;;  %vm1427_vm6 = vcmp.lt.s32.totalorder %v5576_v55, 2 }
 0x1f7   : > { %v1710_v43 = vclz %v3838_v0  ;;  %vm3102_vm7 = vcmp.lt.s32.totalorder %v3101_v30, 2  ;;  %vm3103_vm8 = vcmp.eq.s32.totalorder %v3101_v30, 0  ;;  %v1728_v16 = vsub.s32 4, %v5578_v4 }
 0x1f8   : > { %vm1572_vm9 = vcmp.lt.s32.totalorder %v5585_v27, 2  ;;  %v1587_v9 = vshll.u32 %v1547_v19, 8  ;;  %vm1425_vm10 = vweird.f32 %v5270_v36  ;;  %v1575_v35 = vsel %vm1571_vm2, %v1555_v20, %v1558_v42 }
 0x1f9   : > { %v3839_v7 = vadd.s32 4294967294, %v1710_v43  ;;  %v1582_v10 = vsel %vm1572_vm9, %v1579_v14, %v1581_v52  ;;  %v1585_v51 = vsel %vm1573_vm4, %v1567_v48, %v1584_v61  ;;  %v1577_v23 = vsel %vm1573_vm4, %v1561_v2, %v1576_v18 }
 0x1fa   : > { %v1586_v37 = vsel %vm1572_vm9, %v1583_v63, %v1585_v51  ;;  %v5632_v53 = vmul.u32.u64.low %v1587_v9, %v1582_v10  ;;  %v5633_v57 = vmul.u32.u64.high %v1587_v9, %v1582_v10, %v5632_v53  ;;  %v1851_v62 = vand.u32 2139095040, %v5603_v29 }
 0x1fb   : > { %vm3840_vm11 = vcmp.lt.s32.totalorder %v3839_v7, 0  ;;  %v5636_v44 = vmul.u32.u64.low %v1587_v9, %v1586_v37  ;;  %v5637_v13 = vmul.u32.u64.high %v1587_v9, %v1586_v37, %v5636_v44  ;;  %vm3106_vm12 = vcmp.eq.s32.totalorder %v3101_v30, 2 }
 0x1fc   : > { %v4087_v33 = vpop.eup %4086  ;;  %v1698_v8 = vadd.s32 %v5535_v12, %v5541_v49  ;;  %v1713_v5 = vsel %vm3840_vm11, 0, %v3839_v7  ;;  %v1729_v40 = vsel %vm1644_vm0, %v1728_v16, %v5578_v4  ;;  %v1578_v28 = vsel %vm1572_vm9, %v1575_v35, %v1577_v23 }
 0x1fd   : > { %v4089_v11 = vpop.eup %4088  ;;  %v1432_v26 = vxor.u32 2147483648, %v4087_v33  ;;  %v1714_v15 = vsub.s32 32, %v1713_v5  ;;  %v1718_v47 = vsub.s32 4294967266, %v1713_v5  ;;  %v1715_v41 = vshll.u32 %v5597_v32, %v1713_v5 }
 0x1fe   : > { %v1429_v6 = vxor.u32 2147483648, %v4089_v11  ;;  %v1597_v39 = vadd.s32 1, %v5633_v57  ;;  %v1852_v38 = vshrl.u32 %v1851_v62, 23  ;;  %v1594_v34 = vmul.u32 %v1587_v9, %v1578_v28 }
 0x1ff   : > { %v1433_v12 = vsel %vm1431_vm3, %v1432_v26, %v4089_v11  ;;  %v3108_v49 = vsel %vm3106_vm12, %v1432_v26, %v4089_v11  ;;  %v1716_v4 = vshrl.u32 %v1698_v8, %v1714_v15  ;;  %v1719_v42 = vadd.s32 127, %v1718_v47 }
 0x200   : > { %v1430_v17 = vsel %vm1428_vm5, %v4087_v33, %v1429_v6  ;;  %v3105_v27 = vsel %vm3103_vm8, %v4087_v33, %v1429_v6  ;;  %vm1596_vm13 = vc.u32 %v5637_v13, %v5632_v53  ;;  %v3845_v20 = vadd.s32 4294967169, %v1852_v38 }
 0x201   : > { %v1434_v32 = vsel %vm1427_vm6, %v1430_v17, %v1433_v12  ;;  %v3109_v2 = vsel %vm3102_vm7, %v3105_v27, %v3108_v49  ;;  %v1717_v45 = vor.u32 %v1716_v4, %v1715_v41  ;;  %v1720_v48 = vshll.u32 %v1719_v42, 23 }
 0x202   : > { %v1435_v21 = vsel %vm1425_vm10, nan, %v1434_v32  ;;  %v3110_v19 = vsel %vm1425_vm10, nan, %v3109_v2  ;;  %v1598_v0 = vsel %vm1596_vm13, %v1597_v39, %v5633_v57  ;;  %vm5669_vm14 = vcmp.le.f32.partialorder %v1642_v22, 0.7853982 }
 0x203   : > { %1961 = vst [vmem:[%s4601_s6 + $0x50] sm:$0xff] %v1435_v21  ;;  %3641 = vst [vmem:[%s4606_s7 + $0x50] sm:$0xff] %v3110_v19  ;;  %v1721_v14 = vor.u32 4788187, %v1720_v48  ;;  %v1599_v31 = vadd.s32 %v1598_v0, %v1594_v34  ;;  %v1848_v30 = vand.u32 2147483647, %v5603_v29  ;;  %v5675_v43 = vmul.f32 %v5383_v46, %v274_v1 }
 0x204   : > { %v1858_v63 = vadd.s32 1, %v3845_v20  ;;  %v1724_v18 = vcvt.s32.f32 %v1717_v45  ;;  %v1731_v52 = vsel %vm5669_vm14, 0, %v1729_v40  ;;  %v1595_v41 = vadd.s32 %v5632_v53, %v5637_v13 }
 0x205   : > { %v1722_v36 = vand.u32 2147483647, %v1721_v14  ;;  %v1600_v61 = vadd.s32 536870912, %v1599_v31  ;;  %v3412_v7 = vadd.s32 3, %v1731_v52  ;;  %v1855_v35 = vand.u32 8388607, %v1848_v30 }
 0x206   : > { %vm1859_vm15 = vcmp.gt.s32.totalorder %v1858_v63, 0  ;;  %v1748_v23 = vand.u32 2139095040, %v5675_v43  ;;  %v5687_v44 = vand.u32 3, %v1731_v52  ;;  %vm1734_vm7 = vweird.f32 %v5386_v59 }
 0x207   : > { %v1725_v16 = vmul.f32 %v1724_v18, %v1722_v36  ;;  %v5679_v9 = vshrl.u32 %v1600_v61, 30  ;;  %v1860_v22 = vsel %vm1859_vm15, %v1858_v63, 0  ;;  %v5694_v8 = vand.u32 3, %v3412_v7 }
 0x208   : > { %v1862_v10 = vand.u32 31, %v1860_v22  ;;  %v1856_v5 = vor.u32 8388608, %v1855_v35  ;;  %v1749_v15 = vshrl.u32 %v1748_v23, 23  ;;  %v5705_v38 = vshrl.u32 %v1860_v22, 5 }
 0x209   : > { %v1726_v51 = vxor.u32 2147483648, %v1725_v16  ;;  %v1602_v46 = vshll.u32 %v5679_v9, 30  ;;  %vm3418_vm2 = vcmp.eq.s32.totalorder %v5694_v8, 2  ;;  %vm1737_vm1 = vcmp.eq.s32.totalorder %v5687_v44, 0 }
 0x20a   : > { %v1863_v37 = vsub.s32 32, %v1862_v10  ;;  %v1865_v26 = vshll.u32 %v4205_v50, %v1862_v10  ;;  %v1868_v47 = vshll.u32 %v4206_v54, %v1862_v10  ;;  %v1871_v12 = vshll.u32 %v4207_v56, %v1862_v10 }
 0x20b   : > { %v1727_v57 = vsel %vm1644_vm0, %v1726_v51, %v1725_v16  ;;  %v5689_v62 = vsub.s32 %v1599_v31, %v1602_v46  ;;  %v1874_v42 = vshll.u32 %v4208_v58, %v1862_v10  ;;  %vm1740_vm0 = vcmp.eq.s32.totalorder %v5687_v44, 2 }
 0x20c   : > { %v1730_v33 = vsel %vm5669_vm14, %v5386_v59, %v1727_v57  ;;  %v1866_v40 = vshrl.u32 %v4206_v54, %v1863_v37  ;;  %v1869_v28 = vshrl.u32 %v4207_v56, %v1863_v37  ;;  %v1872_v6 = vshrl.u32 %v4208_v58, %v1863_v37 }
 0x20d   : > { %4090 = vcosq.f32 %v1730_v33  ;;  %v1605_v11 = vsub.s32 0, %v5689_v62  ;;  %v1875_v17 = vshrl.u32 %v4209_v60, %v1863_v37  ;;  %v1877_v53 = vshll.u32 %v4209_v60, %v1862_v10 }
 0x20e   : > { %4092 = vsinq.f32 %v1730_v33  ;;  %v1867_v49 = vor.u32 %v1866_v40, %v1865_v26  ;;  %v1870_v4 = vor.u32 %v1869_v28, %v1868_v47  ;;  %v1873_v34 = vor.u32 %v1872_v6, %v1871_v12 }
 0x20f   : > { %v3834_v39 = vmin.u32 %v1605_v11, %v5689_v62  ;;  %v1878_v13 = vshrl.u32 %v4210_v3, %v1863_v37  ;;  %vm3415_vm3 = vcmp.eq.s32.totalorder %v5694_v8, 0  ;;  %v1864_v32 = vshrl.u32 %v4205_v50, %v1863_v37 }
 0x210   : > { %v1876_v2 = vor.u32 %v1875_v17, %v1874_v42  ;;  %v5717_v45 = vshll.u32 %v1856_v5, 8  ;;  %v3841_v48 = vadd.s32 4294967169, %v1749_v15  ;;  %vm1736_vm4 = vcmp.lt.s32.totalorder %v5687_v44, 2 }
 0x211   : > { %v1607_v27 = vclz %v3834_v39  ;;  %vm3414_vm5 = vcmp.lt.s32.totalorder %v5694_v8, 2  ;;  %v1625_v21 = vsub.s32 4, %v5679_v9  ;;  %v1879_v19 = vor.u32 %v1878_v13, %v1877_v53 }
 0x212   : > { %vm1880_vm6 = vcmp.lt.s32.totalorder %v5705_v38, 1  ;;  %vm1881_vm8 = vcmp.lt.s32.totalorder %v5705_v38, 2  ;;  %vm1882_vm9 = vcmp.lt.s32.totalorder %v5705_v38, 3  ;;  %vm1883_vm10 = vcmp.lt.s32.totalorder %v5705_v38, 4 }
 0x213   : > { %v3835_v1 = vadd.s32 4294967294, %v1607_v27  ;;  %v1884_v0 = vsel %vm1880_vm6, %v1864_v32, %v1867_v49  ;;  %vm1541_vm11 = vcmp.lt.s32.totalorder %v5490_v24, 0  ;;  %v1885_v20 = vsel %vm1883_vm10, %v1873_v34, 2102212464 }
 0x214   : > { %v1888_v14 = vsel %vm1880_vm6, %v1867_v49, %v1870_v4  ;;  %v1889_v31 = vsel %vm1883_vm10, %v1876_v2, 920167782  ;;  %v1892_v36 = vsel %vm1880_vm6, %v1870_v4, %v1873_v34  ;;  %v1893_v18 = vsel %vm1883_vm10, %v1879_v19, 1326507024 }
 0x215   : > { %vm3836_vm12 = vcmp.lt.s32.totalorder %v3835_v1, 0  ;;  %v1890_v63 = vsel %vm1882_vm9, %v1873_v34, %v1889_v31  ;;  %v1886_v22 = vsel %vm1882_vm9, %v1870_v4, %v1885_v20  ;;  %v1755_v7 = vadd.s32 1, %v3841_v48 }
 0x216   : > { %v1610_v55 = vsel %vm3836_vm12, 0, %v3835_v1  ;;  %v1891_v46 = vsel %vm1881_vm8, %v1888_v14, %v1890_v63  ;;  %v1894_v23 = vsel %vm1882_vm9, %v1876_v2, %v1893_v18  ;;  %v1745_v27 = vand.u32 2147483647, %v5675_v43 }
 0x217   : > { %v4091_v52 = vpop.eup %4090  ;;  %v1611_v61 = vsub.s32 32, %v1610_v55  ;;  %v1615_v16 = vsub.s32 4294967266, %v1610_v55  ;;  %v1612_v51 = vshll.u32 %v5689_v62, %v1610_v55  ;;  %v1895_v5 = vsel %vm1881_vm8, %v1892_v36, %v1894_v23 }
 0x218   : > { %v4093_v35 = vpop.eup %4092  ;;  %v1741_v10 = vxor.u32 2147483648, %v4091_v52  ;;  %v5744_v11 = vmul.u32.u64.low %v5717_v45, %v1895_v5  ;;  %v5745_v26 = vmul.u32.u64.high %v5717_v45, %v1895_v5, %v5744_v11  ;;  %v1626_v44 = vsel %vm1541_vm11, %v1625_v21, %v5679_v9 }
 0x219   : > { %v1738_v37 = vxor.u32 2147483648, %v4093_v35  ;;  %v1613_v57 = vshrl.u32 %v1595_v41, %v1611_v61  ;;  %v1616_v33 = vadd.s32 127, %v1615_v16  ;;  %v1887_v8 = vsel %vm1881_vm8, %v1884_v0, %v1886_v22 }
 0x21a   : > { %v1742_v40 = vsel %vm1740_vm0, %v1741_v10, %v4093_v35  ;;  %v3420_v62 = vsel %vm3418_vm2, %v1741_v10, %v4093_v35  ;;  %v5756_v12 = vmul.u32.u64.low %v5717_v45, %v1891_v46  ;;  %v5757_v49 = vmul.u32.u64.high %v5717_v45, %v1891_v46, %v5756_v12 }
 0x21b   : > { %v1739_v15 = vsel %vm1737_vm1, %v4091_v52, %v1738_v37  ;;  %v3417_v47 = vsel %vm3415_vm3, %v4091_v52, %v1738_v37  ;;  %v1614_v28 = vor.u32 %v1613_v57, %v1612_v51  ;;  %v1617_v6 = vshll.u32 %v1616_v33, 23 }
 0x21c   : > { %v1743_v41 = vsel %vm1736_vm4, %v1739_v15, %v1742_v40  ;;  %v3421_v39 = vsel %vm3414_vm5, %v3417_v47, %v3420_v62  ;;  %vm1756_vm13 = vcmp.gt.s32.totalorder %v1755_v7, 0  ;;  %vm1905_vm14 = vc.u32 %v5745_v26, %v5756_v12 }
 0x21d   : > { %v1744_v4 = vsel %vm1734_vm7, nan, %v1743_v41  ;;  %v3422_v42 = vsel %vm1734_vm7, nan, %v3421_v39  ;;  %v1618_v17 = vor.u32 4788187, %v1617_v6  ;;  %v1621_v53 = vcvt.s32.f32 %v1614_v28 }
 0x21e   : > { %1964 = vst [vmem:[%s4601_s6 + $0x68] sm:$0xff] %v1744_v4  ;;  %3644 = vst [vmem:[%s4606_s7 + $0x68] sm:$0xff] %v3422_v42  ;;  %v1757_v59 = vsel %vm1756_vm13, %v1755_v7, 0  ;;  %vm5776_vm15 = vcmp.le.f32.partialorder %v1539_v25, 0.7853982  ;;  %v1906_v32 = vadd.s32 1, %v5757_v49  ;;  %v1903_v48 = vmul.u32 %v5717_v45, %v1887_v8 }
 0x21f   : > { %v1619_v34 = vand.u32 2147483647, %v1618_v17  ;;  %v1759_v2 = vand.u32 31, %v1757_v59  ;;  %v1628_v38 = vsel %vm5776_vm15, 0, %v1626_v44  ;;  %v1752_v1 = vand.u32 8388607, %v1745_v27 }
 0x220   : > { %v1907_v21 = vsel %vm1905_vm14, %v1906_v32, %v5757_v49  ;;  %v5787_v19 = vshrl.u32 %v1757_v59, 5  ;;  %v3308_v46 = vadd.s32 3, %v1628_v38  ;;  %v1632_v40 = vand.u32 3, %v1628_v38 }
 0x221   : > { %v1622_v9 = vmul.f32 %v1621_v53, %v1619_v34  ;;  %v1760_v25 = vsub.s32 32, %v1759_v2  ;;  %v1762_v0 = vshll.u32 %v4205_v50, %v1759_v2  ;;  %v1908_v14 = vadd.s32 %v1907_v21, %v1903_v48 }
 0x222   : > { %v1765_v31 = vshll.u32 %v4206_v54, %v1759_v2  ;;  %v1768_v55 = vshll.u32 %v4207_v56, %v1759_v2  ;;  %v1771_v18 = vshll.u32 %v4208_v58, %v1759_v2  ;;  %v1774_v22 = vshll.u32 %v4209_v60, %v1759_v2 }
 0x223   : > { %v1623_v20 = vxor.u32 2147483648, %v1622_v9  ;;  %v1763_v63 = vshrl.u32 %v4206_v54, %v1760_v25  ;;  %v1766_v45 = vshrl.u32 %v4207_v56, %v1760_v25  ;;  %v1769_v36 = vshrl.u32 %v4208_v58, %v1760_v25 }
 0x224   : > { %v1909_v61 = vadd.s32 536870912, %v1908_v14  ;;  %v1772_v16 = vshrl.u32 %v4209_v60, %v1760_v25  ;;  %v1775_v58 = vshrl.u32 %v4210_v3, %v1760_v25  ;;  %v1753_v23 = vor.u32 8388608, %v1752_v1 }
 0x225   : > { %v1624_v52 = vsel %vm1541_vm11, %v1623_v20, %v1622_v9  ;;  %v1764_v35 = vor.u32 %v1763_v63, %v1762_v0  ;;  %v1767_v54 = vor.u32 %v1766_v45, %v1765_v31  ;;  %v1770_v10 = vor.u32 %v1769_v36, %v1768_v55 }
 0x226   : > { %v1627_v7 = vsel %vm5776_vm15, %v5490_v24, %v1624_v52  ;;  %v5803_v56 = vshrl.u32 %v1909_v61, 30  ;;  %v1773_v51 = vor.u32 %v1772_v16, %v1771_v18  ;;  %v1776_v57 = vor.u32 %v1775_v58, %v1774_v22 }
 0x227   : > { %4094 = vcosq.f32 %v1627_v7  ;;  %vm1777_vm0 = vcmp.lt.s32.totalorder %v5787_v19, 1  ;;  %vm1780_vm2 = vcmp.lt.s32.totalorder %v5787_v19, 4  ;;  %vm1779_vm1 = vcmp.lt.s32.totalorder %v5787_v19, 3 }
 0x228   : > { %4096 = vsinq.f32 %v1627_v7  ;;  %v1911_v37 = vshll.u32 %v5803_v56, 30  ;;  %v1785_v60 = vsel %vm1777_vm0, %v1764_v35, %v1767_v54  ;;  %v1786_v33 = vsel %vm1780_vm2, %v1773_v51, 920167782 }
 0x229   : > { %vm1778_vm3 = vcmp.lt.s32.totalorder %v5787_v19, 2  ;;  %v1787_v3 = vsel %vm1779_vm1, %v1770_v10, %v1786_v33  ;;  %v3309_v62 = vand.u32 3, %v3308_v46  ;;  %v1793_v15 = vshll.u32 %v1753_v23, 8 }
 0x22a   : > { %v1912_v5 = vsub.s32 %v1908_v14, %v1911_v37  ;;  %v1788_v11 = vsel %vm1778_vm3, %v1785_v60, %v1787_v3  ;;  %v1761_v28 = vshrl.u32 %v4205_v50, %v1760_v25  ;;  %v1789_v6 = vsel %vm1777_vm0, %v1767_v54, %v1770_v10 }
 0x22b   : > { %v1790_v41 = vsel %vm1780_vm2, %v1776_v57, 1326507024  ;;  %v1782_v39 = vsel %vm1780_vm2, %v1770_v10, 2102212464  ;;  %v5822_v4 = vmul.u32.u64.low %v1793_v15, %v1788_v11  ;;  %v5823_v42 = vmul.u32.u64.high %v1793_v15, %v1788_v11, %v5822_v4 }
 0x22c   : > { %v1914_v47 = vsub.s32 0, %v1912_v5  ;;  %v1791_v49 = vsel %vm1779_vm1, %v1773_v51, %v1790_v41  ;;  %vm1631_vm4 = vweird.f32 %v5490_v24  ;;  %vm1633_vm5 = vcmp.lt.s32.totalorder %v1632_v40, 2 }
 0x22d   : > { %v1781_v44 = vsel %vm1777_vm0, %v1761_v28, %v1764_v35  ;;  %v1792_v50 = vsel %vm1778_vm3, %v1789_v6, %v1791_v49  ;;  %v1783_v53 = vsel %vm1779_vm1, %v1767_v54, %v1782_v39  ;;  %vm1634_vm6 = vcmp.eq.s32.totalorder %v1632_v40, 0 }
 0x22e   : > { %v3846_v17 = vmin.u32 %v1914_v47, %v1912_v5  ;;  %v5833_v59 = vmul.u32.u64.low %v1793_v15, %v1792_v50  ;;  %v5834_v13 = vmul.u32.u64.high %v1793_v15, %v1792_v50, %v5833_v59  ;;  %vm1637_vm7 = vcmp.eq.s32.totalorder %v1632_v40, 2 }
 0x22f   : > { %vm3310_vm8 = vcmp.lt.s32.totalorder %v3309_v62, 2  ;;  %vm3311_vm9 = vcmp.eq.s32.totalorder %v3309_v62, 0  ;;  %vm3314_vm10 = vcmp.eq.s32.totalorder %v3309_v62, 2  ;;  %v1784_v21 = vsel %vm1778_vm3, %v1781_v44, %v1783_v53 }
 0x230   : > { %v1916_v34 = vclz %v3846_v17  ;;  %v1803_v25 = vadd.s32 1, %v5823_v42  ;;  %v1904_v14 = vadd.s32 %v5756_v12, %v5745_v26  ;;  %vm1802_vm12 = vc.u32 %v5834_v13, %v5822_v4 }
 0x231   : > { %v4095_v8 = vpop.eup %4094  ;;  %v1800_v18 = vmul.u32 %v1793_v15, %v1784_v21  ;;  %v1934_v57 = vsub.s32 4, %v5803_v56  ;;  %vm1850_vm13 = vcmp.lt.s32.totalorder %v5603_v29, 0  ;;  %vm1849_vm14 = vcmp.le.f32.partialorder %v1848_v30, 0.7853982 }
 0x232   : > { %v4097_v32 = vpop.eup %4096  ;;  %v1638_v2 = vxor.u32 2147483648, %v4095_v8  ;;  %v3847_v38 = vadd.s32 4294967294, %v1916_v34  ;;  %v1804_v26 = vsel %vm1802_vm12, %v1803_v25, %v5823_v42  ;;  %v1801_v41 = vadd.s32 %v5822_v4, %v5834_v13 }
 0x233   : > { %v1635_v9 = vxor.u32 2147483648, %v4097_v32  ;;  %v1805_v61 = vadd.s32 %v1804_v26, %v1800_v18  ;;  %v1935_v40 = vsel %vm1850_vm13, %v1934_v57, %v5803_v56  ;;  %vm1940_vm0 = vweird.f32 %v5603_v29 }
 0x234   : > { %v1639_v48 = vsel %vm1637_vm7, %v1638_v2, %v4097_v32  ;;  %v3316_v1 = vsel %vm3314_vm10, %v1638_v2, %v4097_v32  ;;  %vm3848_vm11 = vcmp.lt.s32.totalorder %v3847_v38, 0  ;;  %v1937_v15 = vsel %vm1849_vm14, 0, %v1935_v40 }
 0x235   : > { %v1636_v0 = vsel %vm1634_vm6, %v4095_v8, %v1635_v9  ;;  %v3313_v20 = vsel %vm3311_vm9, %v4095_v8, %v1635_v9  ;;  %v1919_v63 = vsel %vm3848_vm11, 0, %v3847_v38  ;;  %v1806_v7 = vadd.s32 536870912, %v1805_v61 }
 0x236   : > { %v1640_v31 = vsel %vm1633_vm5, %v1636_v0, %v1639_v48  ;;  %v3317_v55 = vsel %vm3310_vm8, %v3313_v20, %v3316_v1  ;;  %v1920_v36 = vsub.s32 32, %v1919_v63  ;;  %v1924_v52 = vsub.s32 4294967266, %v1919_v63 }
 0x237   : > { %v1641_v19 = vsel %vm1631_vm4, nan, %v1640_v31  ;;  %v3318_v45 = vsel %vm1631_vm4, nan, %v3317_v55  ;;  %v1921_v16 = vshll.u32 %v1912_v5, %v1919_v63  ;;  %v5851_v10 = vshrl.u32 %v1806_v7, 30 }
 0x238   : > { %1963 = vst [vmem:[%s4601_s6 + $0x60] sm:$0xff] %v1641_v19  ;;  %3643 = vst [vmem:[%s4606_s7 + $0x60] sm:$0xff] %v3318_v45  ;;  %v1922_v12 = vshrl.u32 %v1904_v14, %v1920_v36  ;;  %v1925_v22 = vadd.s32 127, %v1924_v52  ;;  %v3620_v28 = vadd.s32 3, %v1937_v15  ;;  %v1941_v42 = vand.u32 3, %v1937_v15 }
 0x239   : > { %v1808_v24 = vshll.u32 %v5851_v10, 30  ;;  %v1831_v20 = vsub.s32 4, %v5851_v10  ;;  %vm1747_vm7 = vcmp.lt.s32.totalorder %v5675_v43, 0  ;;  %vm1746_vm8 = vcmp.le.f32.partialorder %v1745_v27, 0.7853982 }
 0x23a   : > { %v1923_v35 = vor.u32 %v1922_v12, %v1921_v16  ;;  %v1926_v54 = vshll.u32 %v1925_v22, 23  ;;  %v3621_v56 = vand.u32 3, %v3620_v28  ;;  %vm1943_vm2 = vcmp.eq.s32.totalorder %v1941_v42, 0 }
 0x23b   : > { %v1809_v23 = vsub.s32 %v1805_v61, %v1808_v24  ;;  %vm1946_vm1 = vcmp.eq.s32.totalorder %v1941_v42, 2  ;;  %vm1942_vm5 = vcmp.lt.s32.totalorder %v1941_v42, 2  ;;  %v1832_v19 = vsel %vm1747_vm7, %v1831_v20, %v5851_v10 }
 0x23c   : > { %v1927_v51 = vor.u32 4788187, %v1926_v54  ;;  %v1930_v46 = vcvt.s32.f32 %v1923_v35  ;;  %vm3623_vm3 = vcmp.eq.s32.totalorder %v3621_v56, 0  ;;  %vm3626_vm4 = vcmp.eq.s32.totalorder %v3621_v56, 2 }
 0x23d   : > { %v1811_v60 = vsub.s32 0, %v1809_v23  ;;  %vm3622_vm6 = vcmp.lt.s32.totalorder %v3621_v56, 2  ;;  %v1834_v36 = vsel %vm1746_vm8, 0, %v1832_v19 }
 0x23e   : > { %v1928_v58 = vand.u32 2147483647, %v1927_v51  ;;  %v1838_v18 = vand.u32 3, %v1834_v36 }
 0x23f   : > { %v3842_v5 = vmin.u32 %v1811_v60, %v1809_v23 }
 0x240   : > { %v1931_v37 = vmul.f32 %v1930_v46, %v1928_v58  ;;  %vm1843_vm9 = vcmp.eq.s32.totalorder %v1838_v18, 2  ;;  %vm1840_vm11 = vcmp.eq.s32.totalorder %v1838_v18, 0 }
 0x241   : > { %v1813_v11 = vclz %v3842_v5 }
 0x242   : > { %v1932_v33 = vxor.u32 2147483648, %v1931_v37 }
 0x243   : > { %v3843_v47 = vadd.s32 4294967294, %v1813_v11 }
 0x244   : > { %v1933_v3 = vsel %vm1850_vm13, %v1932_v33, %v1931_v37  ;;  %vm1839_vm13 = vcmp.lt.s32.totalorder %v1838_v18, 2 }
 0x245   : > { %v1936_v62 = vsel %vm1849_vm14, %v5603_v29, %v1933_v3  ;;  %vm3844_vm15 = vcmp.lt.s32.totalorder %v3843_v47, 0  ;;  %v3516_v29 = vadd.s32 3, %v1834_v36 }
 0x246   : > { %4098 = vcosq.f32 %v1936_v62  ;;  %v1816_v6 = vsel %vm3844_vm15, 0, %v3843_v47  ;;  %vm1837_vm15 = vweird.f32 %v5675_v43 }
 0x247   : > { %4100 = vsinq.f32 %v1936_v62  ;;  %v1817_v39 = vsub.s32 32, %v1816_v6  ;;  %v1821_v49 = vsub.s32 4294967266, %v1816_v6  ;;  %v1818_v30 = vshll.u32 %v1809_v23, %v1816_v6 }
 0x248   : > { %v3517_v52 = vand.u32 3, %v3516_v29 }
 0x249   : > { %v1819_v17 = vshrl.u32 %v1801_v41, %v1817_v39  ;;  %v1822_v44 = vadd.s32 127, %v1821_v49 }
 0x24a   : > { %vm3522_vm10 = vcmp.eq.s32.totalorder %v3517_v52, 2  ;;  %vm3519_vm12 = vcmp.eq.s32.totalorder %v3517_v52, 0  ;;  %vm3518_vm14 = vcmp.lt.s32.totalorder %v3517_v52, 2 }
 0x24b   : > { %v1820_v50 = vor.u32 %v1819_v17, %v1818_v30  ;;  %v1823_v8 = vshll.u32 %v1822_v44, 23 }
 0x24d   : > { %v1824_v32 = vor.u32 4788187, %v1823_v8  ;;  %v1827_v38 = vcvt.s32.f32 %v1820_v50 }
 0x24f   : > { %v1825_v9 = vand.u32 2147483647, %v1824_v32 }
 0x250   : > { %v4099_v34 = vpop.eup %4098 }
 0x251   : > { %v4101_v53 = vpop.eup %4100  ;;  %v1947_v59 = vxor.u32 2147483648, %v4099_v34  ;;  %v1828_v0 = vmul.f32 %v1827_v38, %v1825_v9 }
 0x252   : > { %v1944_v2 = vxor.u32 2147483648, %v4101_v53 }
 0x253   : > { %v1948_v4 = vsel %vm1946_vm1, %v1947_v59, %v4101_v53  ;;  %v3628_v13 = vsel %vm3626_vm4, %v1947_v59, %v4101_v53  ;;  %v1829_v55 = vxor.u32 2147483648, %v1828_v0 }
 0x254   : > { %v1945_v48 = vsel %vm1943_vm2, %v4099_v34, %v1944_v2  ;;  %v3625_v1 = vsel %vm3623_vm3, %v4099_v34, %v1944_v2 }
 0x255   : > { %v1949_v21 = vsel %vm1942_vm5, %v1945_v48, %v1948_v4  ;;  %v3629_v25 = vsel %vm3622_vm6, %v3625_v1, %v3628_v13  ;;  %v1830_v63 = vsel %vm1747_vm7, %v1829_v55, %v1828_v0 }
 0x256   : > { %v1950_v14 = vsel %vm1940_vm0, nan, %v1949_v21  ;;  %v3630_v31 = vsel %vm1940_vm0, nan, %v3629_v25  ;;  %v1833_v45 = vsel %vm1746_vm8, %v5675_v43, %v1830_v63 }
 0x257   : > { %1966 = vst [vmem:[%s4601_s6 + $0x78] sm:$0xff] %v1950_v14  ;;  %3646 = vst [vmem:[%s4606_s7 + $0x78] sm:$0xff] %v3630_v31  ;;  %4102 = vcosq.f32 %v1833_v45 }
 0x258   : > { %4104 = vsinq.f32 %v1833_v45 }
 0x261   : > { %v4103_v26 = vpop.eup %4102 }
 0x262   : > { %v4105_v12 = vpop.eup %4104  ;;  %v1844_v61 = vxor.u32 2147483648, %v4103_v26 }
 0x263   : > { %v1841_v16 = vxor.u32 2147483648, %v4105_v12 }
 0x264   : > { %v1845_v27 = vsel %vm1843_vm9, %v1844_v61, %v4105_v12  ;;  %v3524_v22 = vsel %vm3522_vm10, %v1844_v61, %v4105_v12 }
 0x265   : > { %v1842_v7 = vsel %vm1840_vm11, %v4103_v26, %v1841_v16  ;;  %v3521_v35 = vsel %vm3519_vm12, %v4103_v26, %v1841_v16 }
 0x266   : > { %v1846_v54 = vsel %vm1839_vm13, %v1842_v7, %v1845_v27  ;;  %v3525_v10 = vsel %vm3518_vm14, %v3521_v35, %v3524_v22 }
 0x267   : > { %v1847_v51 = vsel %vm1837_vm15, nan, %v1846_v54  ;;  %v3526_v24 = vsel %vm1837_vm15, nan, %v3525_v10 }
 0x268   : > { %1965 = vst [vmem:[%s4601_s6 + $0x70] sm:$0xff] %v1847_v51  ;;  %3645 = vst [vmem:[%s4606_s7 + $0x70] sm:$0xff] %v3526_v24 }
 0x269   : > { %4121 = shalt.err (!%p4118_p3)
}
 0x26a   : > { %s4122_s6 = scalar_lea.hbm %s5881_s16, 2048  ;;  %s4126_s11 = scalar_lea.hbm %s5968_s2, 4096 }
 0x26b   : > { %p4123_p4 = scmp.ne.s32.totalorder %s5881_s16, %s4122_s6  ;;  %p4127_p9 = scmp.lt.u32.totalorder %s5881_s16, %s5968_s2 }
 0x26c   : > { %p4128_p10 = scmp.lt.u32.totalorder %s4126_s11, %s4122_s6  ;;  %p4130_p12 = scmp.lt.u32.totalorder %s4122_s6, %s5881_s16 }
 0x26d   : > { %p4124_p7 = pnand %p4123_p4, %p4273_p5 }
 0x26e   : > { %p4129_p11 = por %p4128_p10, %p4127_p9 }
 0x26f   : > { %p4125_p8 = pneg %p4124_p7 }
 0x270   : > { %p4131_p13 = por %p4130_p12, %p4129_p11 }
 0x272   : > { %p4132_p0 = pnand %p4131_p13, %p4125_p8 }
 0x274   : > { %4135 = shalt.err (!%p4132_p0)
}
 0x275   : > { %s4212_s25 = smov 128   ;;  %s4213_s26 = smov 8  }
 0x276   : > { %3987 = dma.vmem_to_hbm [thread:$0]  (%p4273_p5), %s5883_s19, 2048, %s5881_s16, %s3648_s29, %s4212_s25, %s4212_s25, %s4213_s26  }
 0x277   : > { %s3653_s27 = scalar_lea.sflag [#allocation5], %s4537_s4  ;;  %s4136_s30 = scalar_lea.vmem %s5891_s20, 2048 }
 0x278   : > { %p4137_p1 = scmp.ne.s32.totalorder %s5891_s20, %s4136_s30  ;;  %s4214_s5 = smov [#allocation4]  }
 0x279   : > { %s4140_s8 = sshll.u32 %s4214_s5, 4  ;;  %s4141_s8 = int_to_ptr.vmem [resolvable:$false] %s4140_s8 }
 0x27a   : > { %p4138_p2 = pnand %p4137_p1, %p4273_p5  ;;  %s4142_s9 = scalar_lea.vmem %s4141_s8, 4096 }
 0x27b   : > { %p4143_p4 = scmp.lt.s32.totalorder %s5891_s20, %s4141_s8  ;;  %p4144_p7 = scmp.lt.s32.totalorder %s4142_s9, %s4136_s30 }
 0x27c   : > { %p4139_p3 = pneg %p4138_p2 }
 0x27d   : > { %p4145_p8 = por %p4144_p7, %p4143_p4 }
 0x27f   : > { %p4146_p9 = pnand %p4145_p8, %p4139_p3 }
 0x281   : > { %4149 = shalt.err (!%p4146_p9)
}
 0x282   : > { %s4150_s19 = scalar_lea.hbm %s5889_s28, 2048  ;;  %s4154_s6 = scalar_lea.hbm %s5969_s3, 4096 }
 0x283   : > { %p4151_p10 = scmp.ne.s32.totalorder %s5889_s28, %s4150_s19  ;;  %p4155_p13 = scmp.lt.u32.totalorder %s5889_s28, %s5969_s3 }
 0x284   : > { %p4156_p0 = scmp.lt.u32.totalorder %s4154_s6, %s4150_s19  ;;  %p4158_p2 = scmp.lt.u32.totalorder %s4150_s19, %s5889_s28 }
 0x285   : > { %p4152_p11 = pnand %p4151_p10, %p4273_p5 }
 0x286   : > { %p4157_p1 = por %p4156_p0, %p4155_p13 }
 0x287   : > { %p4153_p12 = pneg %p4152_p11 }
 0x288   : > { %p4159_p3 = por %p4158_p2, %p4157_p1 }
 0x28a   : > { %p4160_p4 = pnand %p4159_p3, %p4153_p12 }
 0x28c   : > { %4163 = shalt.err (!%p4160_p4)
}
 0x28d   : > { %3988 = dma.vmem_to_hbm [thread:$0]  (%p4273_p5), %s5891_s20, 2048, %s5889_s28, %s3653_s27, %s4212_s25, %s4212_s25, %s4213_s26  }
 0x28e PF: > { %p3998_p7 = scmp.ge.s32.totalorder %s4202_s15, 2  ;;  %s3697_s11 = sand.u32 1, %s4190_s12  }
 0x28f   : > { %s3698_s17 = scalar_lea.sflag [#allocation3], %s3697_s11 }
 0x290   : > { %p3992_p8 = pnand %p3998_p7, %p4277_p6 }
 0x292   : > { %4181 = dma.done.wait (!%p3992_p8), %s3698_s17, 2048  }
 0x293   : > { %4183 = vsyncadd (!%p3992_p8), %s3698_s17, 4294965248  ;;  %s3707_s22 = scalar_lea.sflag [#allocation5], %s3697_s11 }
 0x294   : > { %4185 = dma.done.wait (!%p3992_p8), %s3707_s22, 2048  }
 0x295   : > { %4187 = vsyncadd (!%p3992_p8), %s3707_s22, 4294965248  ;;  %p17_p5 = scmp.ge.s32.totalorder %s4260_s18, 4   ;;  %s6000_s12 = smov %s4194_s13 }
 0x296   : > { %s6001_s13 = smov %s4198_s14  ;;  %s6002_s14 = smov %s4271_s21 }
 0x297   : > { %s6003_s15 = smov %s4260_s18  ;;  %19 = sbr.rel (!%p17_p5) target bundleno = 5 (0x5), region = 80 }
 0x29e   :  { %3712 = vsyncpa [#allocation3], 1 }
 0x29f   :  { %3714 = vsyncpa [#allocation3 + $0x1], 1 }
 0x2a0   :  { %3715 = vsyncpa [#allocation5], 1 }
 0x2a1   :  { %3717 = vsyncpa [#allocation5 + $0x1], 1 }

</bundles_post_ra>
